<compile_context>
chip_gen: v7x
topology: tpu7x:2x2x1
jax: 0.10.0
libtpu: 0.0.40
codegen_flags: <defaults>
</compile_context>

<pallas_src>
import functools

import numpy as np
import jax
import jax.numpy as jnp
from jax.experimental import pallas as pl
from jax.experimental.pallas import tpu as pltpu

BN_EPS = 1e-5


# ----------------------------------------------------------------------------
# Fused MultiTaskHead + sigmoid + 3x3-NMS Pallas kernel
# (one grid step = one block of images packed along the lane dimension)
# ----------------------------------------------------------------------------
def _lpn_fused_kernel(Wp,
                      x_ref, valid_ref, w1_ref, b1_ref, w2_ref, b2_ref,
                      out_ref):
    # Layout: images of this step are stacked along padded rows.  Padded pixel
    # position p = (img*Hp + y + 1)*Wp + (x + 1).  The input block carries an
    # extra G = Wp+1 guard lanes on both ends so every conv1 tap is a
    # contiguous slice; hid (conv1 output over ALL padded positions) plays the
    # same role for conv2 after its guard lanes are zeroed with `valid`.
    #
    # x_ref    : (Cin, G + Lp + G)   bf16, zero except at valid pixels
    # valid_ref: (1, Lp)             f32 {0,1}; 1 exactly at valid pixels
    # w1_ref   : (9, Cmid_t, Cin)    bf16, conv1 of every head, BN scale folded
    # b1_ref   : (Cmid_t, 1)         f32, conv1 bias folded with BN shift
    # w2_ref   : (9, Cout_t, Cmid_t) bf16, block-diagonal conv2 of every head
    # b2_ref   : (Cout_t, 1)         f32
    # out_ref  : (Cout_t + 1, Lb)    f32; rows [0, Cout) = head maps (sigmoid
    #                                on rows 0/1/4), row Cout = NMS'd jmap.
    G = Wp + 1
    Lp = valid_ref.shape[-1]            # padded positions in this step
    Lb = out_ref.shape[-1]              # output positions (= Lp - 2*G)
    Cout = w2_ref.shape[1]
    offs = tuple(dy * Wp + dx for dy in (-1, 0, 1) for dx in (-1, 0, 1))

    xb = x_ref[...]                     # (Cin, G+Lp+G) bf16
    vmask = valid_ref[...]              # (1, Lp) f32

    def conv3x3(src, w_ref, length):
        # 9 accumulating MXU matmuls on contiguous lane slices; no im2col
        # materialisation (tiny live-vreg count; the MXU has huge slack here).
        acc = None
        for t, off in enumerate(offs):
            d = jnp.dot(w_ref[t], src[:, G + off:G + off + length],
                        preferred_element_type=jnp.float32)
            acc = d if acc is None else acc + d
        return acc

    # conv1 (+ folded eval-BN) + ReLU over ALL padded positions, then zero the
    # guard lanes so conv2 sees exact zero padding.
    hid = conv3x3(xb, w1_ref, Lp)                               # (Cmid, Lp) f32
    hid = (jnp.maximum(hid + b1_ref[...], 0.0) * vmask).astype(jnp.bfloat16)

    # conv2 (block-diagonal over heads) only over the positions that map back
    # to the padded interior window [G, G+Lb).
    out = conv3x3(hid, w2_ref, Lb) + b2_ref[...]                # (Cout, Lb) f32

    # epilogue: sigmoid on lmap (row 0), jmap (row 1), cmap (row 4);
    # exp -> EUP, reciprocal(approx=True) -> EUP (divide stays off the VALU).
    sig = pl.reciprocal(1.0 + jnp.exp(-out), approx=True)
    crow = jax.lax.broadcasted_iota(jnp.int32, (Cout, 1), 0)
    out = jnp.where((crow == 0) | (crow == 1) | (crow == 4), sig, out)

    # fused 3x3 NMS on jmap.  jmap = sigmoid(...) > 0, so the zero guard fill
    # is exactly max_pool2d's -inf padding (the centre is in every window).
    jrow = out[1:2, :] * vmask[:, G:G + Lb]                     # zero guards
    zg = jnp.zeros((1, G), jnp.float32)
    jpad = jnp.concatenate([zg, jrow, zg], axis=1)              # (1, Lp), 1 sublane
    mx = jrow
    for off in offs:
        if off != 0:
            mx = jnp.maximum(mx, jpad[:, G + off:G + off + Lb])
    jnms = jnp.where(jrow == mx, jrow, 0.0)

    out_ref[:Cout, :] = out
    out_ref[Cout:, :] = jnms


def fused_multitask_head(xs, valid, params, Wp):
    # xs:    (n_steps, Cin, XL) bf16 padded-layout input blocks
    # valid: (1, Lp) f32 validity mask (identical for every step -> resident)
    n_steps, Cin, XL = xs.shape
    G = Wp + 1
    Lp = XL - 2 * G
    Lb = Lp - 2 * G
    Cmid = params["w1"].shape[1]
    Cout = params["w2"].shape[1]
    kernel = functools.partial(_lpn_fused_kernel, Wp)
    # TODO(synk): at production feature-map sizes, tile the spatial (lane) axis
    # and size the tiles for v7x's 64 MiB VMEM (pltpu.get_tpu_info()); the toy
    # shapes here fit trivially in a single block.
    return pl.pallas_call(
        kernel,
        out_shape=jax.ShapeDtypeStruct((n_steps, Cout + 1, Lb), jnp.float32),
        grid=(n_steps,),
        in_specs=[
            pl.BlockSpec((None, Cin, XL), lambda s: (s, 0, 0)),
            pl.BlockSpec((1, Lp), lambda s: (0, 0)),
            pl.BlockSpec((9, Cmid, Cin), lambda s: (0, 0, 0)),
            pl.BlockSpec((Cmid, 1), lambda s: (0, 0)),
            pl.BlockSpec((9, Cout, Cmid), lambda s: (0, 0, 0)),
            pl.BlockSpec((Cout, 1), lambda s: (0, 0)),
        ],
        out_specs=pl.BlockSpec((None, Cout + 1, Lb), lambda s: (s, 0, 0)),
        compiler_params=pltpu.CompilerParams(
            dimension_semantics=("parallel",)),   # steps are independent
    )(xs, valid, params["w1"], params["b1"], params["w2"], params["b2"])


# ----------------------------------------------------------------------------
# Whole device-side forward under one jit
# ----------------------------------------------------------------------------
@functools.partial(jax.jit, static_argnames=("images_per_step",))
def _lpn_device(features, params, *, images_per_step):
    # features: (N, C, H, W) NCHW.
    N, C, H, W = features.shape
    B = images_per_step
    assert N % B == 0, "batch must be divisible by images_per_step"
    n_steps = N // B
    Hp, Wp = H + 2, W + 2
    G = Wp + 1
    Lp = B * Hp * Wp

    # bf16 activations (native MXU operand dtype); full 2D zero padding and
    # per-step packing of B images along padded rows, with G guard lanes on
    # both ends so every 3x3 tap in the kernel is a contiguous lane slice.
    # TODO(synk): at production sizes build this layout inside the kernel
    # instead of via an XLA pad/transpose round trip through HBM.
    x = features.astype(jnp.bfloat16)
    xp = jnp.pad(x, ((0, 0), (0, 0), (1, 1), (1, 1)))            # (N,C,Hp,Wp)
    xp = xp.reshape(n_steps, B, C, Hp, Wp).transpose(0, 2, 1, 3, 4)
    xp = xp.reshape(n_steps, C, Lp)
    xp = jnp.pad(xp, ((0, 0), (0, 0), (G, G)))                   # (ns,C,XL)

    # validity mask over padded positions (compile-time constant).
    p = np.arange(Lp)
    col = p % Wp
    row = (p // Wp) % Hp
    valid_np = (col >= 1) & (col <= W) & (row >= 1) & (row <= H)
    valid = jnp.asarray(valid_np.astype(np.float32)).reshape(1, Lp)

    out_flat = fused_multitask_head(xp, valid, params, Wp)       # (ns,Cout+1,Lb)
    C1 = out_flat.shape[1]

    # unpack the strided (row stride Wp) layout back to dense NCHW.
    full = jnp.pad(out_flat, ((0, 0), (0, 0), (0, 2 * G)))       # (ns,C1,Lp)
    full = full.reshape(n_steps, C1, B, Hp, Wp)[..., :H, :W]
    full = full.transpose(0, 2, 1, 3, 4).reshape(N, C1, H, W)
    maps_all, jnms = full[:, :C1 - 1], full[:, C1 - 1]

    lmap, jmap = maps_all[:, 0:1], maps_all[:, 1:2]
    joff, cmap, coff = maps_all[:, 2:4], maps_all[:, 4:5], maps_all[:, 5:7]
    lvec = maps_all[:, 7:]
    # channel reorder of lvec (same numpy index trick as the torch code)
    idx = np.arange(lvec.shape[1]).reshape((-1, 2, 2))
    idx[:, 1] = idx[::-1, 1]
    idx = idx.reshape(-1)
    lvec = lvec[:, idx]
    maps_dict = {"lmap": lmap, "jmap": jmap, "joff": joff,
                 "cmap": cmap, "coff": coff, "lvec": lvec}
    return maps_dict, jnms


# ----------------------------------------------------------------------------
# Host-side (numpy) proposal post-processing -- dynamic shapes, no clean Pallas
# equivalent (data-dependent top-k counts, unique, variable-length outputs).
# ----------------------------------------------------------------------------
def calc_junction_np(jmap, joff, thresh, top_K):
    h, w = jmap.shape[-2], jmap.shape[-1]
    score = jmap.reshape(-1)
    joff_t = joff.reshape(2, -1).T
    num = min(int((score >= thresh).sum()), top_K)
    indices = np.argsort(-score, kind="stable")[:num]
    score_s = score[indices]
    y, x = indices // w, indices % w
    junc = np.stack([x, y], axis=1).astype(np.float32) + joff_t[indices] + 0.5
    junc[:, 0] = np.clip(junc[:, 0], 0.0, w - 0.0001)
    junc[:, 1] = np.clip(junc[:, 1], 0.0, h - 0.0001)
    return junc, score_s


def calc_line_np(cmap, coff, lvec, order, thresh, top_K):
    n_pts = order + 1
    h, w = cmap.shape[-2], cmap.shape[-1]
    score = cmap.reshape(-1)
    coff_t = coff.reshape(2, -1).T
    lvec_t = lvec.reshape(n_pts // 2 * 2, 2, -1).transpose(2, 0, 1)
    num = min(int((score >= thresh).sum()), top_K)
    indices = np.argsort(-score, kind="stable")[:num]
    score_s = score[indices]
    y, x = indices // w, indices % w
    center = np.stack([x, y], axis=1).astype(np.float32) + coff_t[indices] + 0.5
    loi = center[:, None] + lvec_t[indices]
    if n_pts % 2 == 1:
        loi = np.concatenate(
            (loi[:, :n_pts // 2], center[:, None], loi[:, n_pts // 2:]), axis=1)
    loi[:, :, 0] = np.clip(loi[:, :, 0], 0.0, w - 0.0001)
    loi[:, :, 1] = np.clip(loi[:, :, 1], 0.0, h - 0.0001)
    return loi, score_s


def _match_proposals_np(loi_pred, junc_pred, order):
    n_pts = order + 1
    if junc_pred.shape[0] == 0 or loi_pred.shape[0] == 0:
        return np.zeros((0, n_pts, 2), np.float32)
    d1 = ((loi_pred[:, None, 0] - junc_pred[None]) ** 2).sum(-1)
    d2 = ((loi_pred[:, None, -1] - junc_pred[None]) ** 2).sum(-1)
    idx1, dist1 = d1.argmin(-1), d1.min(-1)
    idx2, dist2 = d2.argmin(-1), d2.min(-1)
    imn = np.minimum(idx1, idx2)
    imx = np.maximum(idx1, idx2)
    keep = imn != imx
    if not keep.any():
        return np.zeros((0, n_pts, 2), np.float32)
    if order == 1:
        idx_junc = np.unique(np.stack([imn[keep], imx[keep]], axis=1), axis=0)
        out = np.stack([junc_pred[idx_junc[:, 0]], junc_pred[idx_junc[:, 1]]], axis=1)
        mask = out[:, 0, 1] > out[:, 1, 1]
        out[mask] = out[mask][:, ::-1]
        return out.astype(np.float32)
    else:
        loi_k = loi_pred[keep]
        idx_junc = np.stack([imn[keep], imx[keep]], axis=1)
        dist_junc = dist1[keep] + dist2[keep]
        order_idx = np.argsort(dist_junc, kind="stable")
        loi_k = loi_k[order_idx]
        idx_junc = idx_junc[order_idx]
        idx_junc, uniq = np.unique(idx_junc, return_index=True, axis=0)
        end_pred = np.stack([junc_pred[idx_junc[:, 0]], junc_pred[idx_junc[:, 1]]], axis=1)
        mask = end_pred[:, 0, 1] > end_pred[:, 1, 1]
        end_pred[mask] = end_pred[mask][:, ::-1]
        return np.concatenate(
            [end_pred[:, :1], loi_k[uniq, 1:-1], end_pred[:, -1:]], axis=1
        ).astype(np.float32)


# ----------------------------------------------------------------------------
# Parameters (deterministic synthetic init, fused into per-tap matmul layout)
# ----------------------------------------------------------------------------
def init_lpn_params(key, input_channels, output_channels_list):
    # TODO(synk): training-mode BatchNorm (batch statistics) not implemented;
    # eval-mode BN with running stats is folded into conv1 weights/bias here.
    cin = input_channels
    cmid = cin // 4
    n_heads = len(output_channels_list)
    cmid_t = cmid * n_heads
    cout_t = int(sum(output_channels_list))

    w1_taps = np.zeros((9, cmid_t, cin), np.float32)
    b1_all = np.zeros((cmid_t, 1), np.float32)
    w2_taps = np.zeros((9, cout_t, cmid_t), np.float32)
    b2_all = np.zeros((cout_t, 1), np.float32)

    out_off = 0
    for i, oc in enumerate(output_channels_list):
        k = jax.random.fold_in(key, i)
        k1, k2, k3, k4, k5, k6, k7, k8 = jax.random.split(k, 8)
        w1 = np.asarray(jax.random.normal(k1, (3, 3, cin, cmid), jnp.float32)) * 0.1
        b1 = np.asarray(jax.random.normal(k2, (cmid,), jnp.float32)) * 0.1
        gamma = 1.0 + 0.1 * np.asarray(jax.random.normal(k3, (cmid,), jnp.float32))
        beta = 0.1 * np.asarray(jax.random.normal(k4, (cmid,), jnp.float32))
        running_mean = 0.1 * np.asarray(jax.random.normal(k5, (cmid,), jnp.float32))
        running_var = 1.0 + 0.1 * np.abs(
            np.asarray(jax.random.normal(k6, (cmid,), jnp.float32)))
        w2 = np.asarray(jax.random.normal(k7, (3, 3, cmid, oc), jnp.float32)) * 0.1
        b2 = np.asarray(jax.random.normal(k8, (oc,), jnp.float32)) * 0.1

        scale = gamma / np.sqrt(running_var + BN_EPS)        # eval-mode BN fold
        shift = beta - running_mean * scale
        b1f = b1 * scale + shift

        mid_off = i * cmid
        for ky in range(3):
            for kx in range(3):
                t = ky * 3 + kx
                # BN scale folded directly into conv1 rows: scale*(Wx)+b == (scale*W)x+b
                w1_taps[t, mid_off:mid_off + cmid, :] = w1[ky, kx].T * scale[:, None]
                # conv2 is block-diagonal over heads
                w2_taps[t, out_off:out_off + oc, mid_off:mid_off + cmid] = w2[ky, kx].T
        b1_all[mid_off:mid_off + cmid, 0] = b1f
        b2_all[out_off:out_off + oc, 0] = b2
        out_off += oc

    # bf16 weights are the native MXU operand dtype; biases stay f32.
    return {"w1": jnp.asarray(w1_taps, jnp.bfloat16),
            "b1": jnp.asarray(b1_all, jnp.float32),
            "w2": jnp.asarray(w2_taps, jnp.bfloat16),
            "b2": jnp.asarray(b2_all, jnp.float32)}


# ----------------------------------------------------------------------------
# LineProposalNetwork forward (eval mode)
# ----------------------------------------------------------------------------
def lpn_forward(features, params, order,
                junc_thresh=0.008, junc_max_num=300, line_max_num=5000,
                nms_size=3):
    assert nms_size == 3, "fused NMS implemented for nms_size=3 (module default)"
    N = features.shape[0]
    # keep the grid length >= 2 (v7x: one step per TensorCore) while packing as
    # many images as possible into the lane dimension of each step.
    images_per_step = N // 2 if (N >= 2 and N % 2 == 0) else 1
    maps, jmap_nms = _lpn_device(features, params,
                                 images_per_step=images_per_step)

    # one host transfer of everything the numpy post-processing needs.
    # TODO(synk): thresholded top-k / unique / variable-length proposal matching
    # has dynamic shapes; it runs on host in numpy (matches torch python loop).
    host = jax.device_get({"jnms": jmap_nms, "joff": maps["joff"],
                           "cmap": maps["cmap"], "coff": maps["coff"],
                           "lvec": maps["lvec"]})
    loi_preds = []
    for i in range(N):
        junc_pred, _ = calc_junction_np(
            host["jnms"][i], host["joff"][i],
            thresh=junc_thresh, top_K=junc_max_num)
        loi_pred, _ = calc_line_np(
            host["cmap"][i, 0], host["coff"][i], host["lvec"][i], order,
            thresh=0.0, top_K=line_max_num)
        loi_preds.append(_match_proposals_np(loi_pred, junc_pred, order))
    return maps, loi_preds


# ----------------------------------------------------------------------------
if __name__ == "__main__":
    key = jax.random.PRNGKey(0)
    N, C, H, W = 2, 16, 16, 16
    order = 1
    # maps layout: [lmap(1), jmap(1), joff(2), cmap(1), coff(2), lvec(4)] = 11
    output_channels_list = [1, 1, 2, 1, 2, ((order + 1) // 2) * 2 * 2]

    kf, kp = jax.random.split(key)
    features = jax.random.normal(kf, (N, C, H, W), jnp.float32)   # NCHW input
    params = init_lpn_params(kp, C, output_channels_list)

    maps, loi_preds = lpn_forward(features, params, order=order)
    jax.block_until_ready(maps["lmap"])

    assert maps["lmap"].shape == (N, 1, H, W)
    assert maps["jmap"].shape == (N, 1, H, W)
    assert maps["joff"].shape == (N, 2, H, W)
    assert maps["cmap"].shape == (N, 1, H, W)
    assert maps["coff"].shape == (N, 2, H, W)
    assert maps["lvec"].shape == (N, ((order + 1) // 2) * 2 * 2, H, W)
    assert len(loi_preds) == N
    for lp_i in loi_preds:
        assert lp_i.ndim == 3 and lp_i.shape[1:] == (order + 1, 2)

    print("KERNEL_OK")
</pallas_src>

<mosaic_0001>
module attributes {stable_mosaic.version = 11 : i64} {
  func.func @_lpn_fused_kernel(%arg0: i32, %arg1: memref<1x16x362xbf16, #tpu.memory_space<vmem>>, %arg2: memref<1x324xf32, #tpu.memory_space<vmem>>, %arg3: memref<9x24x16xbf16, #tpu.memory_space<vmem>>, %arg4: memref<24x1xf32, #tpu.memory_space<vmem>>, %arg5: memref<9x11x24xbf16, #tpu.memory_space<vmem>>, %arg6: memref<11x1xf32, #tpu.memory_space<vmem>>, %arg7: memref<1x12x286xf32, #tpu.memory_space<vmem>>) attributes {dimension_semantics = [#tpu.dimension_semantics<parallel>], iteration_bounds = array<i64: 2>, scalar_prefetch = 0 : i64, scratch_operands = 0 : i64, tpu.core_type = #tpu.core_type<tc>, window_params = [{transform_indices = @transform_0, window_bounds = array<i64: 1, 16, 362>}, {pipeline_mode = #tpu.pipeline_mode<synchronous>, transform_indices = @transform_1, window_bounds = array<i64: 1, 324>}, {pipeline_mode = #tpu.pipeline_mode<synchronous>, transform_indices = @transform_2, window_bounds = array<i64: 9, 24, 16>}, {pipeline_mode = #tpu.pipeline_mode<synchronous>, transform_indices = @transform_3, window_bounds = array<i64: 24, 1>}, {pipeline_mode = #tpu.pipeline_mode<synchronous>, transform_indices = @transform_4, window_bounds = array<i64: 9, 11, 24>}, {pipeline_mode = #tpu.pipeline_mode<synchronous>, transform_indices = @transform_5, window_bounds = array<i64: 11, 1>}, {transform_indices = @transform_6, window_bounds = array<i64: 1, 12, 286>}]} {
    %c0 = arith.constant 0 : index
    %c0_0 = arith.constant 0 : index
    %c0_1 = arith.constant 0 : index
    %0 = vector.load %arg1[%c0, %c0_0, %c0_1] : memref<1x16x362xbf16, #tpu.memory_space<vmem>>, vector<1x16x362xbf16>
    %1 = vector.shape_cast %0 : vector<1x16x362xbf16> to vector<16x362xbf16>
    %c0_2 = arith.constant 0 : index
    %c0_3 = arith.constant 0 : index
    %2 = vector.load %arg2[%c0_2, %c0_3] : memref<1x324xf32, #tpu.memory_space<vmem>>, vector<1x324xf32>
    %c0_4 = arith.constant 0 : index
    %c0_5 = arith.constant 0 : index
    %c0_6 = arith.constant 0 : index
    %3 = vector.load %arg3[%c0_4, %c0_5, %c0_6] : memref<9x24x16xbf16, #tpu.memory_space<vmem>>, vector<1x24x16xbf16>
    %4 = vector.shape_cast %3 : vector<1x24x16xbf16> to vector<24x16xbf16>
    %5 = vector.extract_strided_slice %1 {offsets = [0, 0], sizes = [16, 324], strides = [1, 1]} : vector<16x362xbf16> to vector<16x324xbf16>
    %cst = arith.constant dense<0.000000e+00> : vector<24x324xf32>
    %6 = tpu.matmul %4, %5, %cst {dimension_numbers = #tpu.dot_dimension_numbers<[1], [0], [0], [1], [0, 0, 1, 1], [], []>} : vector<24x16xbf16>, vector<16x324xbf16>, vector<24x324xf32> -> vector<24x324xf32>
    %c1 = arith.constant 1 : index
    %c0_7 = arith.constant 0 : index
    %c0_8 = arith.constant 0 : index
    %7 = vector.load %arg3[%c1, %c0_7, %c0_8] : memref<9x24x16xbf16, #tpu.memory_space<vmem>>, vector<1x24x16xbf16>
    %8 = vector.shape_cast %7 : vector<1x24x16xbf16> to vector<24x16xbf16>
    %9 = vector.extract_strided_slice %1 {offsets = [0, 1], sizes = [16, 324], strides = [1, 1]} : vector<16x362xbf16> to vector<16x324xbf16>
    %cst_9 = arith.constant dense<0.000000e+00> : vector<24x324xf32>
    %10 = tpu.matmul %8, %9, %cst_9 {dimension_numbers = #tpu.dot_dimension_numbers<[1], [0], [0], [1], [0, 0, 1, 1], [], []>} : vector<24x16xbf16>, vector<16x324xbf16>, vector<24x324xf32> -> vector<24x324xf32>
    %11 = arith.addf %6, %10 : vector<24x324xf32>
    %c2 = arith.constant 2 : index
    %c0_10 = arith.constant 0 : index
    %c0_11 = arith.constant 0 : index
    %12 = vector.load %arg3[%c2, %c0_10, %c0_11] : memref<9x24x16xbf16, #tpu.memory_space<vmem>>, vector<1x24x16xbf16>
    %13 = vector.shape_cast %12 : vector<1x24x16xbf16> to vector<24x16xbf16>
    %14 = vector.extract_strided_slice %1 {offsets = [0, 2], sizes = [16, 324], strides = [1, 1]} : vector<16x362xbf16> to vector<16x324xbf16>
    %cst_12 = arith.constant dense<0.000000e+00> : vector<24x324xf32>
    %15 = tpu.matmul %13, %14, %cst_12 {dimension_numbers = #tpu.dot_dimension_numbers<[1], [0], [0], [1], [0, 0, 1, 1], [], []>} : vector<24x16xbf16>, vector<16x324xbf16>, vector<24x324xf32> -> vector<24x324xf32>
    %16 = arith.addf %11, %15 : vector<24x324xf32>
    %c3 = arith.constant 3 : index
    %c0_13 = arith.constant 0 : index
    %c0_14 = arith.constant 0 : index
    %17 = vector.load %arg3[%c3, %c0_13, %c0_14] : memref<9x24x16xbf16, #tpu.memory_space<vmem>>, vector<1x24x16xbf16>
    %18 = vector.shape_cast %17 : vector<1x24x16xbf16> to vector<24x16xbf16>
    %19 = vector.extract_strided_slice %1 {offsets = [0, 18], sizes = [16, 324], strides = [1, 1]} : vector<16x362xbf16> to vector<16x324xbf16>
    %cst_15 = arith.constant dense<0.000000e+00> : vector<24x324xf32>
    %20 = tpu.matmul %18, %19, %cst_15 {dimension_numbers = #tpu.dot_dimension_numbers<[1], [0], [0], [1], [0, 0, 1, 1], [], []>} : vector<24x16xbf16>, vector<16x324xbf16>, vector<24x324xf32> -> vector<24x324xf32>
    %21 = arith.addf %16, %20 : vector<24x324xf32>
    %c4 = arith.constant 4 : index
    %c0_16 = arith.constant 0 : index
    %c0_17 = arith.constant 0 : index
    %22 = vector.load %arg3[%c4, %c0_16, %c0_17] : memref<9x24x16xbf16, #tpu.memory_space<vmem>>, vector<1x24x16xbf16>
    %23 = vector.shape_cast %22 : vector<1x24x16xbf16> to vector<24x16xbf16>
    %24 = vector.extract_strided_slice %1 {offsets = [0, 19], sizes = [16, 324], strides = [1, 1]} : vector<16x362xbf16> to vector<16x324xbf16>
    %cst_18 = arith.constant dense<0.000000e+00> : vector<24x324xf32>
    %25 = tpu.matmul %23, %24, %cst_18 {dimension_numbers = #tpu.dot_dimension_numbers<[1], [0], [0], [1], [0, 0, 1, 1], [], []>} : vector<24x16xbf16>, vector<16x324xbf16>, vector<24x324xf32> -> vector<24x324xf32>
    %26 = arith.addf %21, %25 : vector<24x324xf32>
    %c5 = arith.constant 5 : index
    %c0_19 = arith.constant 0 : index
    %c0_20 = arith.constant 0 : index
    %27 = vector.load %arg3[%c5, %c0_19, %c0_20] : memref<9x24x16xbf16, #tpu.memory_space<vmem>>, vector<1x24x16xbf16>
    %28 = vector.shape_cast %27 : vector<1x24x16xbf16> to vector<24x16xbf16>
    %29 = vector.extract_strided_slice %1 {offsets = [0, 20], sizes = [16, 324], strides = [1, 1]} : vector<16x362xbf16> to vector<16x324xbf16>
    %cst_21 = arith.constant dense<0.000000e+00> : vector<24x324xf32>
    %30 = tpu.matmul %28, %29, %cst_21 {dimension_numbers = #tpu.dot_dimension_numbers<[1], [0], [0], [1], [0, 0, 1, 1], [], []>} : vector<24x16xbf16>, vector<16x324xbf16>, vector<24x324xf32> -> vector<24x324xf32>
    %31 = arith.addf %26, %30 : vector<24x324xf32>
    %c6 = arith.constant 6 : index
    %c0_22 = arith.constant 0 : index
    %c0_23 = arith.constant 0 : index
    %32 = vector.load %arg3[%c6, %c0_22, %c0_23] : memref<9x24x16xbf16, #tpu.memory_space<vmem>>, vector<1x24x16xbf16>
    %33 = vector.shape_cast %32 : vector<1x24x16xbf16> to vector<24x16xbf16>
    %34 = vector.extract_strided_slice %1 {offsets = [0, 36], sizes = [16, 324], strides = [1, 1]} : vector<16x362xbf16> to vector<16x324xbf16>
    %cst_24 = arith.constant dense<0.000000e+00> : vector<24x324xf32>
    %35 = tpu.matmul %33, %34, %cst_24 {dimension_numbers = #tpu.dot_dimension_numbers<[1], [0], [0], [1], [0, 0, 1, 1], [], []>} : vector<24x16xbf16>, vector<16x324xbf16>, vector<24x324xf32> -> vector<24x324xf32>
    %36 = arith.addf %31, %35 : vector<24x324xf32>
    %c7 = arith.constant 7 : index
    %c0_25 = arith.constant 0 : index
    %c0_26 = arith.constant 0 : index
    %37 = vector.load %arg3[%c7, %c0_25, %c0_26] : memref<9x24x16xbf16, #tpu.memory_space<vmem>>, vector<1x24x16xbf16>
    %38 = vector.shape_cast %37 : vector<1x24x16xbf16> to vector<24x16xbf16>
    %39 = vector.extract_strided_slice %1 {offsets = [0, 37], sizes = [16, 324], strides = [1, 1]} : vector<16x362xbf16> to vector<16x324xbf16>
    %cst_27 = arith.constant dense<0.000000e+00> : vector<24x324xf32>
    %40 = tpu.matmul %38, %39, %cst_27 {dimension_numbers = #tpu.dot_dimension_numbers<[1], [0], [0], [1], [0, 0, 1, 1], [], []>} : vector<24x16xbf16>, vector<16x324xbf16>, vector<24x324xf32> -> vector<24x324xf32>
    %41 = arith.addf %36, %40 : vector<24x324xf32>
    %c8 = arith.constant 8 : index
    %c0_28 = arith.constant 0 : index
    %c0_29 = arith.constant 0 : index
    %42 = vector.load %arg3[%c8, %c0_28, %c0_29] : memref<9x24x16xbf16, #tpu.memory_space<vmem>>, vector<1x24x16xbf16>
    %43 = vector.shape_cast %42 : vector<1x24x16xbf16> to vector<24x16xbf16>
    %44 = vector.extract_strided_slice %1 {offsets = [0, 38], sizes = [16, 324], strides = [1, 1]} : vector<16x362xbf16> to vector<16x324xbf16>
    %cst_30 = arith.constant dense<0.000000e+00> : vector<24x324xf32>
    %45 = tpu.matmul %43, %44, %cst_30 {dimension_numbers = #tpu.dot_dimension_numbers<[1], [0], [0], [1], [0, 0, 1, 1], [], []>} : vector<24x16xbf16>, vector<16x324xbf16>, vector<24x324xf32> -> vector<24x324xf32>
    %46 = arith.addf %41, %45 : vector<24x324xf32>
    %c0_31 = arith.constant 0 : index
    %c0_32 = arith.constant 0 : index
    %47 = vector.load %arg4[%c0_31, %c0_32] : memref<24x1xf32, #tpu.memory_space<vmem>>, vector<24x1xf32>
    %48 = vector.broadcast %47 : vector<24x1xf32> to vector<24x324xf32>
    %49 = arith.addf %46, %48 : vector<24x324xf32>
    %cst_33 = arith.constant 0.000000e+00 : f32
    %50 = vector.broadcast %cst_33 : f32 to vector<24x324xf32>
    %51 = arith.maximumf %49, %50 : vector<24x324xf32>
    %52 = vector.broadcast %2 : vector<1x324xf32> to vector<24x324xf32>
    %53 = arith.mulf %51, %52 : vector<24x324xf32>
    %54 = arith.truncf %53 : vector<24x324xf32> to vector<24x324xbf16>
    %c0_34 = arith.constant 0 : index
    %c0_35 = arith.constant 0 : index
    %c0_36 = arith.constant 0 : index
    %55 = vector.load %arg5[%c0_34, %c0_35, %c0_36] : memref<9x11x24xbf16, #tpu.memory_space<vmem>>, vector<1x11x24xbf16>
    %56 = vector.shape_cast %55 : vector<1x11x24xbf16> to vector<11x24xbf16>
    %57 = vector.extract_strided_slice %54 {offsets = [0, 0], sizes = [24, 286], strides = [1, 1]} : vector<24x324xbf16> to vector<24x286xbf16>
    %cst_37 = arith.constant dense<0.000000e+00> : vector<11x286xf32>
    %58 = tpu.matmul %56, %57, %cst_37 {dimension_numbers = #tpu.dot_dimension_numbers<[1], [0], [0], [1], [0, 0, 1, 1], [], []>} : vector<11x24xbf16>, vector<24x286xbf16>, vector<11x286xf32> -> vector<11x286xf32>
    %c1_38 = arith.constant 1 : index
    %c0_39 = arith.constant 0 : index
    %c0_40 = arith.constant 0 : index
    %59 = vector.load %arg5[%c1_38, %c0_39, %c0_40] : memref<9x11x24xbf16, #tpu.memory_space<vmem>>, vector<1x11x24xbf16>
    %60 = vector.shape_cast %59 : vector<1x11x24xbf16> to vector<11x24xbf16>
    %61 = vector.extract_strided_slice %54 {offsets = [0, 1], sizes = [24, 286], strides = [1, 1]} : vector<24x324xbf16> to vector<24x286xbf16>
    %cst_41 = arith.constant dense<0.000000e+00> : vector<11x286xf32>
    %62 = tpu.matmul %60, %61, %cst_41 {dimension_numbers = #tpu.dot_dimension_numbers<[1], [0], [0], [1], [0, 0, 1, 1], [], []>} : vector<11x24xbf16>, vector<24x286xbf16>, vector<11x286xf32> -> vector<11x286xf32>
    %63 = arith.addf %58, %62 : vector<11x286xf32>
    %c2_42 = arith.constant 2 : index
    %c0_43 = arith.constant 0 : index
    %c0_44 = arith.constant 0 : index
    %64 = vector.load %arg5[%c2_42, %c0_43, %c0_44] : memref<9x11x24xbf16, #tpu.memory_space<vmem>>, vector<1x11x24xbf16>
    %65 = vector.shape_cast %64 : vector<1x11x24xbf16> to vector<11x24xbf16>
    %66 = vector.extract_strided_slice %54 {offsets = [0, 2], sizes = [24, 286], strides = [1, 1]} : vector<24x324xbf16> to vector<24x286xbf16>
    %cst_45 = arith.constant dense<0.000000e+00> : vector<11x286xf32>
    %67 = tpu.matmul %65, %66, %cst_45 {dimension_numbers = #tpu.dot_dimension_numbers<[1], [0], [0], [1], [0, 0, 1, 1], [], []>} : vector<11x24xbf16>, vector<24x286xbf16>, vector<11x286xf32> -> vector<11x286xf32>
    %68 = arith.addf %63, %67 : vector<11x286xf32>
    %c3_46 = arith.constant 3 : index
    %c0_47 = arith.constant 0 : index
    %c0_48 = arith.constant 0 : index
    %69 = vector.load %arg5[%c3_46, %c0_47, %c0_48] : memref<9x11x24xbf16, #tpu.memory_space<vmem>>, vector<1x11x24xbf16>
    %70 = vector.shape_cast %69 : vector<1x11x24xbf16> to vector<11x24xbf16>
    %71 = vector.extract_strided_slice %54 {offsets = [0, 18], sizes = [24, 286], strides = [1, 1]} : vector<24x324xbf16> to vector<24x286xbf16>
    %cst_49 = arith.constant dense<0.000000e+00> : vector<11x286xf32>
    %72 = tpu.matmul %70, %71, %cst_49 {dimension_numbers = #tpu.dot_dimension_numbers<[1], [0], [0], [1], [0, 0, 1, 1], [], []>} : vector<11x24xbf16>, vector<24x286xbf16>, vector<11x286xf32> -> vector<11x286xf32>
    %73 = arith.addf %68, %72 : vector<11x286xf32>
    %c4_50 = arith.constant 4 : index
    %c0_51 = arith.constant 0 : index
    %c0_52 = arith.constant 0 : index
    %74 = vector.load %arg5[%c4_50, %c0_51, %c0_52] : memref<9x11x24xbf16, #tpu.memory_space<vmem>>, vector<1x11x24xbf16>
    %75 = vector.shape_cast %74 : vector<1x11x24xbf16> to vector<11x24xbf16>
    %76 = vector.extract_strided_slice %54 {offsets = [0, 19], sizes = [24, 286], strides = [1, 1]} : vector<24x324xbf16> to vector<24x286xbf16>
    %cst_53 = arith.constant dense<0.000000e+00> : vector<11x286xf32>
    %77 = tpu.matmul %75, %76, %cst_53 {dimension_numbers = #tpu.dot_dimension_numbers<[1], [0], [0], [1], [0, 0, 1, 1], [], []>} : vector<11x24xbf16>, vector<24x286xbf16>, vector<11x286xf32> -> vector<11x286xf32>
    %78 = arith.addf %73, %77 : vector<11x286xf32>
    %c5_54 = arith.constant 5 : index
    %c0_55 = arith.constant 0 : index
    %c0_56 = arith.constant 0 : index
    %79 = vector.load %arg5[%c5_54, %c0_55, %c0_56] : memref<9x11x24xbf16, #tpu.memory_space<vmem>>, vector<1x11x24xbf16>
    %80 = vector.shape_cast %79 : vector<1x11x24xbf16> to vector<11x24xbf16>
    %81 = vector.extract_strided_slice %54 {offsets = [0, 20], sizes = [24, 286], strides = [1, 1]} : vector<24x324xbf16> to vector<24x286xbf16>
    %cst_57 = arith.constant dense<0.000000e+00> : vector<11x286xf32>
    %82 = tpu.matmul %80, %81, %cst_57 {dimension_numbers = #tpu.dot_dimension_numbers<[1], [0], [0], [1], [0, 0, 1, 1], [], []>} : vector<11x24xbf16>, vector<24x286xbf16>, vector<11x286xf32> -> vector<11x286xf32>
    %83 = arith.addf %78, %82 : vector<11x286xf32>
    %c6_58 = arith.constant 6 : index
    %c0_59 = arith.constant 0 : index
    %c0_60 = arith.constant 0 : index
    %84 = vector.load %arg5[%c6_58, %c0_59, %c0_60] : memref<9x11x24xbf16, #tpu.memory_space<vmem>>, vector<1x11x24xbf16>
    %85 = vector.shape_cast %84 : vector<1x11x24xbf16> to vector<11x24xbf16>
    %86 = vector.extract_strided_slice %54 {offsets = [0, 36], sizes = [24, 286], strides = [1, 1]} : vector<24x324xbf16> to vector<24x286xbf16>
    %cst_61 = arith.constant dense<0.000000e+00> : vector<11x286xf32>
    %87 = tpu.matmul %85, %86, %cst_61 {dimension_numbers = #tpu.dot_dimension_numbers<[1], [0], [0], [1], [0, 0, 1, 1], [], []>} : vector<11x24xbf16>, vector<24x286xbf16>, vector<11x286xf32> -> vector<11x286xf32>
    %88 = arith.addf %83, %87 : vector<11x286xf32>
    %c7_62 = arith.constant 7 : index
    %c0_63 = arith.constant 0 : index
    %c0_64 = arith.constant 0 : index
    %89 = vector.load %arg5[%c7_62, %c0_63, %c0_64] : memref<9x11x24xbf16, #tpu.memory_space<vmem>>, vector<1x11x24xbf16>
    %90 = vector.shape_cast %89 : vector<1x11x24xbf16> to vector<11x24xbf16>
    %91 = vector.extract_strided_slice %54 {offsets = [0, 37], sizes = [24, 286], strides = [1, 1]} : vector<24x324xbf16> to vector<24x286xbf16>
    %cst_65 = arith.constant dense<0.000000e+00> : vector<11x286xf32>
    %92 = tpu.matmul %90, %91, %cst_65 {dimension_numbers = #tpu.dot_dimension_numbers<[1], [0], [0], [1], [0, 0, 1, 1], [], []>} : vector<11x24xbf16>, vector<24x286xbf16>, vector<11x286xf32> -> vector<11x286xf32>
    %93 = arith.addf %88, %92 : vector<11x286xf32>
    %c8_66 = arith.constant 8 : index
    %c0_67 = arith.constant 0 : index
    %c0_68 = arith.constant 0 : index
    %94 = vector.load %arg5[%c8_66, %c0_67, %c0_68] : memref<9x11x24xbf16, #tpu.memory_space<vmem>>, vector<1x11x24xbf16>
    %95 = vector.shape_cast %94 : vector<1x11x24xbf16> to vector<11x24xbf16>
    %96 = vector.extract_strided_slice %54 {offsets = [0, 38], sizes = [24, 286], strides = [1, 1]} : vector<24x324xbf16> to vector<24x286xbf16>
    %cst_69 = arith.constant dense<0.000000e+00> : vector<11x286xf32>
    %97 = tpu.matmul %95, %96, %cst_69 {dimension_numbers = #tpu.dot_dimension_numbers<[1], [0], [0], [1], [0, 0, 1, 1], [], []>} : vector<11x24xbf16>, vector<24x286xbf16>, vector<11x286xf32> -> vector<11x286xf32>
    %98 = arith.addf %93, %97 : vector<11x286xf32>
    %c0_70 = arith.constant 0 : index
    %c0_71 = arith.constant 0 : index
    %99 = vector.load %arg6[%c0_70, %c0_71] : memref<11x1xf32, #tpu.memory_space<vmem>>, vector<11x1xf32>
    %100 = vector.broadcast %99 : vector<11x1xf32> to vector<11x286xf32>
    %101 = arith.addf %98, %100 : vector<11x286xf32>
    %cst_72 = arith.constant 0.000000e+00 : f32
    %102 = vector.broadcast %cst_72 : f32 to vector<11x286xf32>
    %103 = arith.subf %102, %101 : vector<11x286xf32>
    %104 = math.exp %103 : vector<11x286xf32>
    %cst_73 = arith.constant 1.000000e+00 : f32
    %105 = vector.broadcast %cst_73 : f32 to vector<11x286xf32>
    %106 = arith.addf %105, %104 : vector<11x286xf32>
    %107 = tpu.reciprocal %106 {approx = true} : vector<11x286xf32> -> vector<11x286xf32>
    %108 = tpu.iota {dimensions = array<i32: 0>} : vector<11x1xi32>
    %c0_i32 = arith.constant 0 : i32
    %109 = vector.broadcast %c0_i32 : i32 to vector<11x1xi32>
    %110 = arith.cmpi eq, %108, %109 : vector<11x1xi32>
    %c1_i32 = arith.constant 1 : i32
    %111 = vector.broadcast %c1_i32 : i32 to vector<11x1xi32>
    %112 = arith.cmpi eq, %108, %111 : vector<11x1xi32>
    %113 = arith.ori %110, %112 : vector<11x1xi1>
    %c4_i32 = arith.constant 4 : i32
    %114 = vector.broadcast %c4_i32 : i32 to vector<11x1xi32>
    %115 = arith.cmpi eq, %108, %114 : vector<11x1xi32>
    %116 = arith.ori %113, %115 : vector<11x1xi1>
    %117 = vector.shape_cast %116 : vector<11x1xi1> to vector<11x1xi1>
    %118 = vector.broadcast %117 : vector<11x1xi1> to vector<11x286xi1>
    %119 = arith.select %118, %107, %101 : vector<11x286xi1>, vector<11x286xf32>
    %120 = vector.extract_strided_slice %119 {offsets = [1, 0], sizes = [1, 286], strides = [1, 1]} : vector<11x286xf32> to vector<1x286xf32>
    %121 = vector.extract_strided_slice %2 {offsets = [0, 19], sizes = [1, 286], strides = [1, 1]} : vector<1x324xf32> to vector<1x286xf32>
    %122 = arith.mulf %120, %121 : vector<1x286xf32>
    %cst_74 = arith.constant 0.000000e+00 : f32
    %123 = vector.broadcast %cst_74 : f32 to vector<1x19xf32>
    %124 = tpu.concatenate %123, %122, %123 in 1 : vector<1x19xf32>, vector<1x286xf32>, vector<1x19xf32> -> vector<1x324xf32>
    %125 = vector.extract_strided_slice %124 {offsets = [0, 0], sizes = [1, 286], strides = [1, 1]} : vector<1x324xf32> to vector<1x286xf32>
    %126 = arith.maximumf %122, %125 : vector<1x286xf32>
    %127 = vector.extract_strided_slice %124 {offsets = [0, 1], sizes = [1, 286], strides = [1, 1]} : vector<1x324xf32> to vector<1x286xf32>
    %128 = arith.maximumf %126, %127 : vector<1x286xf32>
    %129 = vector.extract_strided_slice %124 {offsets = [0, 2], sizes = [1, 286], strides = [1, 1]} : vector<1x324xf32> to vector<1x286xf32>
    %130 = arith.maximumf %128, %129 : vector<1x286xf32>
    %131 = vector.extract_strided_slice %124 {offsets = [0, 18], sizes = [1, 286], strides = [1, 1]} : vector<1x324xf32> to vector<1x286xf32>
    %132 = arith.maximumf %130, %131 : vector<1x286xf32>
    %133 = vector.extract_strided_slice %124 {offsets = [0, 20], sizes = [1, 286], strides = [1, 1]} : vector<1x324xf32> to vector<1x286xf32>
    %134 = arith.maximumf %132, %133 : vector<1x286xf32>
    %135 = vector.extract_strided_slice %124 {offsets = [0, 36], sizes = [1, 286], strides = [1, 1]} : vector<1x324xf32> to vector<1x286xf32>
    %136 = arith.maximumf %134, %135 : vector<1x286xf32>
    %137 = vector.extract_strided_slice %124 {offsets = [0, 37], sizes = [1, 286], strides = [1, 1]} : vector<1x324xf32> to vector<1x286xf32>
    %138 = arith.maximumf %136, %137 : vector<1x286xf32>
    %139 = vector.extract_strided_slice %124 {offsets = [0, 38], sizes = [1, 286], strides = [1, 1]} : vector<1x324xf32> to vector<1x286xf32>
    %140 = arith.maximumf %138, %139 : vector<1x286xf32>
    %141 = arith.cmpf oeq, %122, %140 : vector<1x286xf32>
    %cst_75 = arith.constant 0.000000e+00 : f32
    %142 = vector.broadcast %cst_75 : f32 to vector<1x286xf32>
    %143 = arith.select %141, %122, %142 : vector<1x286xi1>, vector<1x286xf32>
    %c0_76 = arith.constant 0 : index
    %c0_77 = arith.constant 0 : index
    %c0_78 = arith.constant 0 : index
    %144 = vector.load %arg7[%c0_76, %c0_77, %c0_78] : memref<1x12x286xf32, #tpu.memory_space<vmem>>, vector<1x11x286xf32>
    %145 = vector.shape_cast %144 : vector<1x11x286xf32> to vector<11x286xf32>
    %146 = vector.shape_cast %119 : vector<11x286xf32> to vector<1x11x286xf32>
    tpu.vector_store %arg7[%c0_76, %c0_77, %c0_78], %146 {strides = array<i32>} : memref<1x12x286xf32, #tpu.memory_space<vmem>>, vector<1x11x286xf32>,
    %c0_79 = arith.constant 0 : index
    %c11 = arith.constant 11 : index
    %c0_80 = arith.constant 0 : index
    %147 = vector.load %arg7[%c0_79, %c11, %c0_80] : memref<1x12x286xf32, #tpu.memory_space<vmem>>, vector<1x1x286xf32>
    %148 = vector.shape_cast %147 : vector<1x1x286xf32> to vector<1x286xf32>
    %149 = vector.shape_cast %143 : vector<1x286xf32> to vector<1x1x286xf32>
    tpu.vector_store %arg7[%c0_79, %c11, %c0_80], %149 {strides = array<i32>} : memref<1x12x286xf32, #tpu.memory_space<vmem>>, vector<1x1x286xf32>,
    return
  }
  func.func @transform_0(%arg0: i32) -> (i32, i32, i32) {
    %c0_i32 = arith.constant 0 : i32
    %c0_i32_0 = arith.constant 0 : i32
    %c0_i32_1 = arith.constant 0 : i32
    return %arg0, %c0_i32, %c0_i32_0 : i32, i32, i32
  }
  func.func @transform_1(%arg0: i32) -> (i32, i32) {
    %c0_i32 = arith.constant 0 : i32
    %c0_i32_0 = arith.constant 0 : i32
    %c0_i32_1 = arith.constant 0 : i32
    return %c0_i32, %c0_i32_0 : i32, i32
  }
  func.func @transform_2(%arg0: i32) -> (i32, i32, i32) {
    %c0_i32 = arith.constant 0 : i32
    %c0_i32_0 = arith.constant 0 : i32
    %c0_i32_1 = arith.constant 0 : i32
    %c0_i32_2 = arith.constant 0 : i32
    return %c0_i32, %c0_i32_0, %c0_i32_1 : i32, i32, i32
  }
  func.func @transform_3(%arg0: i32) -> (i32, i32) {
    %c0_i32 = arith.constant 0 : i32
    %c0_i32_0 = arith.constant 0 : i32
    %c0_i32_1 = arith.constant 0 : i32
    return %c0_i32, %c0_i32_0 : i32, i32
  }
  func.func @transform_4(%arg0: i32) -> (i32, i32, i32) {
    %c0_i32 = arith.constant 0 : i32
    %c0_i32_0 = arith.constant 0 : i32
    %c0_i32_1 = arith.constant 0 : i32
    %c0_i32_2 = arith.constant 0 : i32
    return %c0_i32, %c0_i32_0, %c0_i32_1 : i32, i32, i32
  }
  func.func @transform_5(%arg0: i32) -> (i32, i32) {
    %c0_i32 = arith.constant 0 : i32
    %c0_i32_0 = arith.constant 0 : i32
    %c0_i32_1 = arith.constant 0 : i32
    return %c0_i32, %c0_i32_0 : i32, i32
  }
  func.func @transform_6(%arg0: i32) -> (i32, i32, i32) {
    %c0_i32 = arith.constant 0 : i32
    %c0_i32_0 = arith.constant 0 : i32
    %c0_i32_1 = arith.constant 0 : i32
    return %arg0, %c0_i32, %c0_i32_0 : i32, i32, i32
  }
}

</mosaic_0001>

<bundles_post_ra>
// kernel: _lpn_device.1
= control target key start
LH: loop header
LB: loop body
LE: loop exit
PB: predicated region body
PF: predicated region fallthrough
CT: control target
= control target key end

     0   :  { %s3526_s21 = smov 0   ;;  %s4157_s0 = inlined_call_operand.vmem [shape: bf16[2,16,362], index: 0, kind: input, shape index: {}]   ;;  %s4158_s1 = inlined_call_operand.vmem [shape: f32[1,324], index: 1, kind: input, shape index: {}]   ;;  %s4159_s2 = inlined_call_operand.vmem [shape: bf16[9,24,16], index: 2, kind: input, shape index: {}]   ;;  %s4160_s3 = inlined_call_operand.vmem [shape: f32[24,1], index: 3, kind: input, shape index: {}]   ;;  %s4161_s4 = inlined_call_operand.vmem [shape: bf16[9,11,24], index: 4, kind: input, shape index: {}]   ;;  %s4162_s5 = inlined_call_operand.vmem [shape: f32[11,1], index: 5, kind: input, shape index: {}]   ;;  %s4163_s6 = inlined_call_operand.vmem [shape: f32[2,12,286], index: 6, kind: output, shape index: {}]  }
   0x1 LB: > { %s3015_s22 = sadd.s32 4294967295, %s3476_s21   ;;  %p3019_p0 = scmp.ge.s32.totalorder %s3476_s21, 1  ;;  %s3476_s21 = sphi %s3526_s21, %s16_s21  }
   0x2   : > { %p212_p1 = scmp.lt.s32.totalorder %s3476_s21, 3 }
   0x4   : > { %p213_p2 = pnand %p3019_p0, %p212_p1 }
   0x5   : > { %p242_p3 = scmp.lt.s32.totalorder (!%p213_p2), %s3015_s22, 1  ;;  %v3539_v0 = vld [vmem:[%s4159_s2 + $0xc] sm:$0xff] (!%p213_p2)   ;;  %v3478_v1 = vmov (!%p213_p2), 0   ;;  %vm298_vm0 = vcmask (!%p213_p2), 130048   ;;  %s3479_s29 = smov (!%p213_p2), 127   ;;  %vm292_vm1 = vcmask (!%p213_p2), 1039360  }
   0x6   : > { %216 = sbr.rel (%p213_p2) target bundleno = 1278 (0x4fe), region = 44  ;;  %337 = vmatprep.mubr.bf16.mxu0 (!%p213_p2), %v3478_v1  ;;  %3426 = vset.pattern.permute.xlu1 (!%p213_p2), %v3478_v1  ;;  %s3480_s30 = smov (!%p213_p2), 126   ;;  %vm538_vm2 = vcmask (!%p213_p2), 1031168   ;;  %v3432_v10 = vld [vmem:[%s4159_s2 + $0x14] ss:$0 sps:$4 sm:$0xff] (!%p213_p2)   ;;  %v3433_v14 = vld [vmem:[%s4159_s2] sm:$0xff] (!%p213_p2)  }
   0x7   : > { %3214 = vmatprep.mubr.msk.bf16.mxu1 (!%p213_p2), %vm298_vm0, %v3539_v0  ;;  %3425 = vset.pattern.permute.xlu0 (!%p213_p2), %v3478_v1  ;;  %s3481_s7 = smov (!%p213_p2), 110   ;;  %s3482_s8 = smov (!%p213_p2), 109   ;;  %v3434_v16 = vld [vmem:[%s4159_s2 + $0x8] ss:$0 sps:$4 sm:$0xff] (!%p213_p2)   ;;  %v3435_v18 = vld [vmem:[%s4159_s2 + $0x18] sm:$0xff] (!%p213_p2)   ;;  %v1486_v21 = vld [vmem:[%s4160_s3] sm:$0xff] (!%p213_p2) }
   0x8   : > { %s3483_s9 = smov (!%p213_p2), 108   ;;  %s3484_s10 = smov (!%p213_p2), 92   ;;  %v1487_v20 = vld [vmem:[%s4160_s3 + $0x8] sm:$0xff] (!%p213_p2)  ;;  %v3436_v23 = vld [vmem:[%s4159_s2 + $0x20] ss:$0 sps:$4 sm:$0xff] (!%p213_p2)   ;;  %v1488_v25 = vld [vmem:[%s4160_s3 + $0x10] sm:$0xff] (!%p213_p2) }
   0x9   : > { %s3485_s11 = smov (!%p213_p2), 91   ;;  %s3486_s12 = smov (!%p213_p2), 90   ;;  %vm676_vm3 = vcmask (!%p213_p2), 900096   ;;  %v3437_v27 = vld [vmem:[%s4159_s2 + $0x24] sm:$0xff] (!%p213_p2)   ;;  %v3438_v31 = vld [vmem:[%s4159_s2 + $0x2c] ss:$0 sps:$4 sm:$0xff] (!%p213_p2)  }
   0xa   : > { %v3625_v33 = vld [vmem:[%s4159_s2 + $0x30] sm:$0xff] (!%p213_p2)   ;;  %v3440_v36 = vld [vmem:[%s4159_s2 + $0x38] ss:$0 sps:$4 sm:$0xff] (!%p213_p2)   ;;  %vm814_vm4 = vcmask (!%p213_p2), 891904   ;;  %v3441_v39 = vld [vmem:[%s4159_s2 + $0x3c] sm:$0xff] (!%p213_p2)   ;;  %vm952_vm5 = vcmask (!%p213_p2), 883712  }
   0xb   : > { %v3442_v43 = vld [vmem:[%s4159_s2 + $0x44] ss:$0 sps:$4 sm:$0xff] (!%p213_p2)   ;;  %v3443_v45 = vld [vmem:[%s4159_s2 + $0x48] sm:$0xff] (!%p213_p2)   ;;  %v3444_v48 = vld [vmem:[%s4159_s2 + $0x50] ss:$0 sps:$4 sm:$0xff] (!%p213_p2)   ;;  %vm1090_vm6 = vcmask (!%p213_p2), 752640  }
   0xc   : > { %v3445_v50 = vld [vmem:[%s4159_s2 + $0x54] sm:$0xff] (!%p213_p2)   ;;  %v3446_v53 = vld [vmem:[%s4159_s2 + $0x5c] ss:$0 sps:$4 sm:$0xff] (!%p213_p2)   ;;  %v3447_v54 = vld [vmem:[%s4159_s2 + $0x60] sm:$0xff] (!%p213_p2)   ;;  %vm1228_vm7 = vcmask (!%p213_p2), 744448   ;;  %vm1366_vm8 = vcmask (!%p213_p2), 736256  }
   0xd   : > { %s4167_s22 = smov (!%p242_p3, %s3015_s22), 1  ;;  %v3448_v55 = vld [vmem:[%s4159_s2 + $0x68] ss:$0 sps:$4 sm:$0xff]   ;;  %vm3488_vm9 = vmmov 0   ;;  %vm1592_vm10 = vcmask 1043456   ;;  %vm1588_vm11 = vcmask 195584  }
   0xe   : > { %s3402_s25 = smul.u32 24, %s4167_s22 }
   0xf   : > { %s3403_s17 = smul.u32 48, %s4167_s22  ;;  %s3489_s22 = smov 19  }
  0x10   : > { %s246_s28 = scalar_lea.vmem %s4157_s0, %s3402_s25 }
  0x11   : > { %v3427_v2 = vld [vmem:[%s246_s28 + $0x4] ss:$12 sps:$4 sm:$0xff]   ;;  %v3429_v3 = vld [vmem:[%s246_s28] ss:$12 sps:$4 sm:$0xff]   ;;  %v3430_v4 = vld [vmem:[%s246_s28 + $0x8] ss:$12 sps:$4 sm:$0xff]   ;;  %s4071_s20 = scalar_lea.vmem %s4163_s6, %s3403_s17 }
  0x12   : > { %288 = vrot.lane.b32.xlu0 %v3427_v2, %s3479_s29  ;;  %286 = vrot.lane.b32.xlu1 %v3429_v3, %s3479_s29 }
  0x16   : > { %290 = vrot.lane.b32.xlu0 %v3430_v4, %s3479_s29  ;;  %534 = vrot.lane.b32.xlu1 %v3427_v2, %s3480_s30 }
  0x1a   : > { %536 = vrot.lane.b32.xlu0 %v3430_v4, %s3480_s30  ;;  %532 = vrot.lane.b32.xlu1 %v3429_v3, %s3480_s30 }
  0x1e   : > { %672 = vrot.lane.b32.xlu0 %v3427_v2, %s3481_s7  ;;  %674 = vrot.lane.b32.xlu1 %v3430_v4, %s3481_s7 }
  0x22   : > { %670 = vrot.lane.b32.xlu0 %v3429_v3, %s3481_s7  ;;  %810 = vrot.lane.b32.xlu1 %v3427_v2, %s3482_s8 }
  0x26   : > { %812 = vrot.lane.b32.xlu0 %v3430_v4, %s3482_s8  ;;  %808 = vrot.lane.b32.xlu1 %v3429_v3, %s3482_s8 }
  0x2a   : > { %948 = vrot.lane.b32.xlu0 %v3427_v2, %s3483_s9  ;;  %950 = vrot.lane.b32.xlu1 %v3430_v4, %s3483_s9 }
  0x2e   : > { %946 = vrot.lane.b32.xlu0 %v3429_v3, %s3483_s9  ;;  %1086 = vrot.lane.b32.xlu1 %v3427_v2, %s3484_s10 }
  0x32   : > { %1088 = vrot.lane.b32.xlu0 %v3430_v4, %s3484_s10  ;;  %1084 = vrot.lane.b32.xlu1 %v3429_v3, %s3484_s10 }
  0x36   : > { %1224 = vrot.lane.b32.xlu0 %v3427_v2, %s3485_s11  ;;  %1226 = vrot.lane.b32.xlu1 %v3430_v4, %s3485_s11 }
  0x3a   : > { %1222 = vrot.lane.b32.xlu0 %v3429_v3, %s3485_s11  ;;  %1362 = vrot.lane.b32.xlu1 %v3427_v2, %s3486_s12 }
  0x3e   : > { %1364 = vrot.lane.b32.xlu0 %v3430_v4, %s3486_s12  ;;  %1360 = vrot.lane.b32.xlu1 %v3429_v3, %s3486_s12 }
  0x42   : > { %1496 = vperm.xlu1 %3426, %v1487_v20   ;;  %1491 = vperm.xlu0 %3425, %v1486_v21  }
  0x46   : > { %1501 = vperm.xlu1 %3426, %v1488_v25  }
  0x84   : > { %v289_v5 = vpop.permute.xlu0 %288  ;;  %v287_v6 = vpop.permute.xlu1 %286 }
  0x85   : > { %v293_v9 = vsel %vm292_vm1, %v287_v6, %v289_v5 }
  0x88   : > { %v291_v7 = vpop.permute.xlu0 %290  ;;  %v535_v11 = vpop.permute.xlu1 %534 }
  0x89   : > { %3212 = vmatprep.subr.bf16.mxu1 %v291_v7  ;;  %v294_v8 = vsel %vm292_vm1, %v289_v5, %v291_v7 }
  0x8a   : > { %305 = vmatprep.subr.bf16.mxu0 %v294_v8  ;;  %3213 = vmatpush3.bf16.msra.mxu1 %v291_v7 }
  0x8b   : > { %306 = vmatpush1.bf16.msra.mxu0 %v293_v9  ;;  %3218 = vmatprep.subr.bf16.mxu1 %v3430_v4 }
  0x8c   : > { %421 = vmatprep.subr.bf16.mxu0 %v3427_v2  ;;  %v537_v12 = vpop.permute.xlu0 %536  ;;  %v533_v15 = vpop.permute.xlu1 %532 }
  0x8d   : > { %3215 = vmatmul.mubr.msk.bf16.vlgmr.msra.gmra.mrb[0].mxu1 %vm298_vm0, %v3432_v10  ;;  %v540_v13 = vsel %vm538_vm2, %v535_v11, %v537_v12  ;;  %v539_v26 = vsel %vm538_vm2, %v533_v15, %v535_v11 }
  0x8e   : > { %3030 = vmatmul.mubr.msk.bf16.vlgmr.msra.gmra.mrb[0].mxu0 %vm298_vm0, %v3539_v0  ;;  %3219 = vmatpush3.bf16.msra.mxu1 %v3430_v4 }
  0x8f   : > { %422 = vmatpush1.bf16.msra.mxu0 %v3429_v3  ;;  %347 = vmatprep.mubr.bf16.mxu0 %v3478_v1 }
  0x90   : > { %550 = vmatprep.subr.bf16.mxu0 %v540_v13  ;;  %3220 = vmatprep.mubr.msk.bf16.mxu1 %vm298_vm0, %v3433_v14  ;;  %v673_v17 = vpop.permute.xlu0 %672  ;;  %v675_v19 = vpop.permute.xlu1 %674 }
  0x91   : > { %3224 = vmatprep.subr.bf16.mxu1 %v537_v12  ;;  %v678_v28 = vsel %vm676_vm3, %v673_v17, %v675_v19 }
  0x94   : > { %v671_v22 = vpop.permute.xlu0 %670  ;;  %v811_v24 = vpop.permute.xlu1 %810 }
  0x95   : > { %3221 = vmatmul.mubr.msk.bf16.vlgmr.msra.gmra.mrb[4].mxu1 %vm298_vm0, %v3434_v16  ;;  %v677_v38 = vsel %vm676_vm3, %v671_v22, %v673_v17 }
  0x96   : > { %3031 = vmatmul.mubr.msk.bf16.gmra.mrb[4].mxu0 %vm298_vm0, %v3432_v10  ;;  %3225 = vmatpush3.bf16.msra.mxu1 %v537_v12 }
  0x97   : > { %453 = vmatprep.mubr.bf16.mxu0 %v3478_v1  ;;  %3226 = vmatprep.mubr.msk.bf16.mxu1 %vm298_vm0, %v3435_v18 }
  0x98   : > { %3230 = vmatprep.subr.bf16.mxu1 %v675_v19  ;;  %v813_v29 = vpop.permute.xlu0 %812  ;;  %v809_v30 = vpop.permute.xlu1 %808 }
  0x99   : > { %v816_v40 = vsel %vm814_vm4, %v811_v24, %v813_v29  ;;  %v815_v49 = vsel %vm814_vm4, %v809_v30, %v811_v24 }
  0x9c   : > { %v949_v32 = vpop.permute.xlu0 %948  ;;  %v951_v34 = vpop.permute.xlu1 %950 }
  0x9d   : > { %3227 = vmatmul.mubr.msk.bf16.vlgmr.msra.gmra.mrb[8].mxu1 %vm298_vm0, %v3436_v23  ;;  %v954_v51 = vsel %vm952_vm5, %v949_v32, %v951_v34 }
  0x9e   : > { %3036 = vmatmul.mubr.msk.bf16.vlgmr.msra.gmra.mrb[0].mxu0 %vm298_vm0, %v3433_v14  ;;  %3231 = vmatpush3.bf16.msra.mxu1 %v675_v19 }
  0x9f   : > { %551 = vmatpush1.bf16.msra.mxu0 %v539_v26  ;;  %463 = vmatprep.mubr.bf16.mxu0 %v3478_v1 }
  0xa0   : > { %688 = vmatprep.subr.bf16.mxu0 %v678_v28  ;;  %3232 = vmatprep.mubr.msk.bf16.mxu1 %vm298_vm0, %v3437_v27  ;;  %v947_v35 = vpop.permute.xlu0 %946  ;;  %v1087_v37 = vpop.permute.xlu1 %1086 }
  0xa1   : > { %3236 = vmatprep.subr.bf16.mxu1 %v813_v29  ;;  %v953_v56 = vsel %vm952_vm5, %v947_v35, %v949_v32 }
  0xa4   : > { %v1089_v41 = vpop.permute.xlu0 %1088  ;;  %v1085_v42 = vpop.permute.xlu1 %1084 }
  0xa5   : > { %3233 = vmatmul.mubr.msk.bf16.vlgmr.msra.gmra.mrb[12].mxu1 %vm298_vm0, %v3438_v31  ;;  %v1092_v57 = vsel %vm1090_vm6, %v1087_v37, %v1089_v41  ;;  %v1091_v58 = vsel %vm1090_vm6, %v1085_v42, %v1087_v37 }
  0xa6   : > { %3037 = vmatmul.mubr.msk.bf16.gmra.mrb[8].mxu0 %vm298_vm0, %v3434_v16  ;;  %3237 = vmatpush3.bf16.msra.mxu1 %v813_v29 }
  0xa7   : > { %582 = vmatprep.mubr.bf16.mxu0 %v3478_v1  ;;  %3238 = vmatprep.mubr.msk.bf16.mxu1 %vm298_vm0, %v3625_v33 }
  0xa8   : > { %3242 = vmatprep.subr.bf16.mxu1 %v951_v34  ;;  %v1225_v44 = vpop.permute.xlu0 %1224  ;;  %v1227_v46 = vpop.permute.xlu1 %1226 }
  0xa9   : > { %v1230_v59 = vsel %vm1228_vm7, %v1225_v44, %v1227_v46 }
  0xac   : > { %v1223_v47 = vpop.permute.xlu0 %1222  ;;  %v1363_v61 = vpop.permute.xlu1 %1362 }
  0xad   : > { %3239 = vmatmul.mubr.msk.bf16.vlgmr.msra.gmra.mrb[16].mxu1 %vm298_vm0, %v3440_v36  ;;  %v1229_v60 = vsel %vm1228_vm7, %v1223_v47, %v1225_v44 }
  0xae   : > { %3045 = vmatmul.mubr.msk.bf16.vlgmr.msra.gmra.mrb[0].mxu0 %vm298_vm0, %v3435_v18  ;;  %3243 = vmatpush3.bf16.msra.mxu1 %v951_v34 }
  0xaf   : > { %689 = vmatpush1.bf16.msra.mxu0 %v677_v38  ;;  %592 = vmatprep.mubr.bf16.mxu0 %v3478_v1 }
  0xb0   : > { %826 = vmatprep.subr.bf16.mxu0 %v816_v40  ;;  %3244 = vmatprep.mubr.msk.bf16.mxu1 %vm298_vm0, %v3441_v39  ;;  %v1365_v52 = vpop.permute.xlu0 %1364  ;;  %v1361_v63 = vpop.permute.xlu1 %1360 }
  0xb1   : > { %3248 = vmatprep.subr.bf16.mxu1 %v1089_v41  ;;  %v1368_v62 = vsel %vm1366_vm8, %v1363_v61, %v1365_v52  ;;  %v1367_v0 = vsel %vm1366_vm8, %v1361_v63, %v1363_v61 }
  0xb5   : > { %3245 = vmatmul.mubr.msk.bf16.vlgmr.msra.gmra.mrb[20].mxu1 %vm298_vm0, %v3442_v43 }
  0xb6   : > { %3046 = vmatmul.mubr.msk.bf16.gmra.mrb[12].mxu0 %vm298_vm0, %v3436_v23  ;;  %3249 = vmatpush3.bf16.msra.mxu1 %v1089_v41 }
  0xb7   : > { %720 = vmatprep.mubr.bf16.mxu0 %v3478_v1  ;;  %3250 = vmatprep.mubr.msk.bf16.mxu1 %vm298_vm0, %v3443_v45 }
  0xb8   : > { %3254 = vmatprep.subr.bf16.mxu1 %v1227_v46 }
  0xbd   : > { %3251 = vmatmul.mubr.msk.bf16.vlgmr.msra.gmra.mrb[24].mxu1 %vm298_vm0, %v3444_v48 }
  0xbe   : > { %3054 = vmatmul.mubr.msk.bf16.vlgmr.msra.gmra.mrb[0].mxu0 %vm298_vm0, %v3437_v27  ;;  %3255 = vmatpush3.bf16.msra.mxu1 %v1227_v46 }
  0xbf   : > { %827 = vmatpush1.bf16.msra.mxu0 %v815_v49  ;;  %730 = vmatprep.mubr.bf16.mxu0 %v3478_v1 }
  0xc0   : > { %964 = vmatprep.subr.bf16.mxu0 %v954_v51  ;;  %3256 = vmatprep.mubr.msk.bf16.mxu1 %vm298_vm0, %v3445_v50 }
  0xc1   : > { %3260 = vmatprep.subr.bf16.mxu1 %v1365_v52 }
  0xc5   : > { %3257 = vmatmul.mubr.msk.bf16.vlgmr.msra.gmra.mrb[28].mxu1 %vm298_vm0, %v3446_v53 }
  0xc6   : > { %3055 = vmatmul.mubr.msk.bf16.gmra.mrb[16].mxu0 %vm298_vm0, %v3438_v31  ;;  %3261 = vmatpush3.bf16.msra.mxu1 %v1365_v52 }
  0xc7   : > { %858 = vmatprep.mubr.bf16.mxu0 %v3478_v1  ;;  %3262 = vmatprep.mubr.msk.bf16.mxu1 %vm298_vm0, %v3447_v54 }
  0xcd   : > { %3263 = vmatmul.mubr.msk.bf16.vlgmr.msra.gmra.mrb[32].mxu1 %vm298_vm0, %v3448_v55 }
  0xce   : > { %3063 = vmatmul.mubr.msk.bf16.vlgmr.msra.gmra.mrb[0].mxu0 %vm298_vm0, %v3625_v33  ;;  %1634 = vmatprep.mubr.bf16.mxu1 %v3478_v1 }
  0xcf   : > { %965 = vmatpush1.bf16.msra.mxu0 %v953_v56  ;;  %868 = vmatprep.mubr.bf16.mxu0 %v3478_v1 }
  0xd0   : > { %1102 = vmatprep.subr.bf16.mxu0 %v1092_v57 }
  0xd6   : > { %3064 = vmatmul.mubr.msk.bf16.gmra.mrb[20].mxu0 %vm298_vm0, %v3440_v36 }
  0xd7   : > { %996 = vmatprep.mubr.bf16.mxu0 %v3478_v1 }
  0xde   : > { %3072 = vmatmul.mubr.msk.bf16.vlgmr.msra.gmra.mrb[0].mxu0 %vm298_vm0, %v3441_v39 }
  0xdf   : > { %1103 = vmatpush1.bf16.msra.mxu0 %v1091_v58  ;;  %1006 = vmatprep.mubr.bf16.mxu0 %v3478_v1 }
  0xe0   : > { %1240 = vmatprep.subr.bf16.mxu0 %v1230_v59 }
  0xe6   : > { %3073 = vmatmul.mubr.msk.bf16.gmra.mrb[24].mxu0 %vm298_vm0, %v3442_v43 }
  0xe7   : > { %1134 = vmatprep.mubr.bf16.mxu0 %v3478_v1 }
  0xee   : > { %3081 = vmatmul.mubr.msk.bf16.vlgmr.msra.gmra.mrb[0].mxu0 %vm298_vm0, %v3443_v45 }
  0xef   : > { %1241 = vmatpush1.bf16.msra.mxu0 %v1229_v60  ;;  %1144 = vmatprep.mubr.bf16.mxu0 %v3478_v1 }
  0xf0   : > { %1378 = vmatprep.subr.bf16.mxu0 %v1368_v62 }
  0xf6   : > { %3082 = vmatmul.mubr.msk.bf16.gmra.mrb[28].mxu0 %vm298_vm0, %v3444_v48 }
  0xf7   : > { %1272 = vmatprep.mubr.bf16.mxu0 %v3478_v1 }
  0xfe   : > { %3090 = vmatmul.mubr.msk.bf16.vlgmr.msra.gmra.mrb[0].mxu0 %vm298_vm0, %v3445_v50 }
  0xff   : > { %1379 = vmatpush1.bf16.msra.mxu0 %v1367_v0  ;;  %1282 = vmatprep.mubr.bf16.mxu0 %v3478_v1 }
 0x106   : > { %3091 = vmatmul.mubr.msk.bf16.gmra.mrb[32].mxu0 %vm298_vm0, %v3446_v53 }
 0x107   : > { %1410 = vmatprep.mubr.bf16.mxu0 %v3478_v1 }
 0x10e   : > { %3099 = vmatmul.mubr.msk.bf16.vlgmr.msra.gmra.mrb[0].mxu0 %vm298_vm0, %v3447_v54 }
 0x10f   : > { %1420 = vmatprep.mubr.bf16.mxu0 %v3478_v1 }
 0x116   : > { %3100 = vmatmul.mubr.msk.bf16.gmra.mrb[36].mxu0 %vm298_vm0, %v3448_v55 }
 0x160   : > { %v3216_v2 = vpop.f32.mrb[0].mxu1 }
 0x161   : > { %v390_v3 = vpop.f32.mrb[1].mxu1 }
 0x162   : > { %v3217_v4 = vpop.f32.mrb[2].mxu1 }
 0x163   : > { %v393_v5 = vpop.f32.mrb[3].mxu1 }
 0x168   : > { %v3222_v6 = vpop.f32.mrb[4].mxu1 }
 0x169   : > { %v349_v7 = vpop.f32.mrb[4].mxu0  ;;  %v515_v8 = vadd.f32 %v3222_v6, %v3216_v2  ;;  %v506_v9 = vpop.f32.mrb[5].mxu1  ;;  %v1523_v2 = vlaneseq }
 0x16a   : > { %v351_v10 = vpop.f32.mrb[5].mxu0  ;;  %v507_v11 = vadd.f32 %v506_v9, %v390_v3  ;;  %v3223_v12 = vpop.f32.mrb[6].mxu1 }
 0x16b   : > { %v353_v13 = vpop.f32.mrb[6].mxu0  ;;  %v509_v14 = vpop.f32.mrb[7].mxu1 }
 0x16c   : > { %v354_v15 = vpop.f32.mrb[7].mxu0  ;;  %v510_v16 = vadd.f32 %v509_v14, %v393_v5 }
 0x16d   : > { %v3709_v15 = vshrl.u32 %v1523_v2, 7 }
 0x16f   : > { %vm2741_vm12 = vcmp.eq.s32.totalorder %v3709_v15, 0  ;;  %vm2743_vm13 = vcmp.eq.s32.totalorder %v3709_v15, 1  ;;  %vm2747_vm15 = vcmp.eq.s32.totalorder %v3709_v15, 4 }
 0x170   : > { %v3228_v17 = vpop.f32.mrb[8].mxu1  ;;  %vm2745_vm14 = vmor %vm2741_vm12, %vm2743_vm13 }
 0x171   : > { %v657_v18 = vadd.f32 %v3228_v17, %v515_v8  ;;  %v635_v19 = vpop.f32.mrb[9].mxu1  ;;  %v1533_v17 = vsub.s32 2, %v3709_v15  ;;  %vm4062_vm0 = vmor %vm2745_vm14, %vm2747_vm15 }
 0x172   : > { %v651_v20 = vadd.f32 %v635_v19, %v507_v11  ;;  %v3229_v21 = vpop.f32.mrb[10].mxu1 }
 0x173   : > { %v638_v22 = vpop.f32.mrb[11].mxu1  ;;  %v1492_v21 = vpop.permute.xlu0 %1491 }
 0x174   : > { %v654_v23 = vadd.f32 %v638_v22, %v510_v16 }
 0x178   : > { %v3234_v24 = vpop.f32.mrb[12].mxu1 }
 0x179   : > { %v465_v25 = vpop.f32.mrb[8].mxu0  ;;  %v795_v26 = vadd.f32 %v3234_v24, %v657_v18  ;;  %v773_v27 = vpop.f32.mrb[13].mxu1 }
 0x17a   : > { %v466_v28 = vadd.f32 %v465_v25, %v349_v7  ;;  %v467_v29 = vpop.f32.mrb[9].mxu0  ;;  %v789_v30 = vadd.f32 %v773_v27, %v651_v20  ;;  %v3235_v31 = vpop.f32.mrb[14].mxu1  ;;  %v257_v20 = vld [vmem:[%s4158_s1] sm:$0x7] }
 0x17b   : > { %v468_v32 = vadd.f32 %v467_v29, %v351_v10  ;;  %v469_v33 = vpop.f32.mrb[10].mxu0  ;;  %v776_v34 = vpop.f32.mrb[15].mxu1 }
 0x17c   : > { %v470_v35 = vpop.f32.mrb[11].mxu0  ;;  %v792_v36 = vadd.f32 %v776_v34, %v654_v23 }
 0x180   : > { %v3240_v37 = vpop.f32.mrb[16].mxu1 }
 0x181   : > { %v933_v38 = vadd.f32 %v3240_v37, %v795_v26  ;;  %v911_v39 = vpop.f32.mrb[17].mxu1  ;;  %v3717_v26 = vrot.slane %v257_v20, %v1533_v17 }
 0x182   : > { %v927_v40 = vadd.f32 %v911_v39, %v789_v30  ;;  %v3241_v41 = vpop.f32.mrb[18].mxu1 }
 0x183   : > { %v914_v42 = vpop.f32.mrb[19].mxu1 }
 0x184   : > { %v930_v43 = vadd.f32 %v914_v42, %v792_v36 }
 0x188   : > { %v3246_v44 = vpop.f32.mrb[20].mxu1 }
 0x189   : > { %v594_v45 = vpop.f32.mrb[12].mxu0  ;;  %v1071_v46 = vadd.f32 %v3246_v44, %v933_v38  ;;  %v1049_v47 = vpop.f32.mrb[21].mxu1 }
 0x18a   : > { %v655_v48 = vadd.f32 %v594_v45, %v466_v28  ;;  %v596_v49 = vpop.f32.mrb[13].mxu0  ;;  %v1065_v50 = vadd.f32 %v1049_v47, %v927_v40  ;;  %v3247_v51 = vpop.f32.mrb[22].mxu1 }
 0x18b   : > { %v656_v52 = vadd.f32 %v596_v49, %v468_v32  ;;  %v598_v53 = vpop.f32.mrb[14].mxu0  ;;  %v1052_v54 = vpop.f32.mrb[23].mxu1 }
 0x18c   : > { %v599_v55 = vpop.f32.mrb[15].mxu0  ;;  %v1068_v56 = vadd.f32 %v1052_v54, %v930_v43  ;;  %v1497_v28 = vpop.permute.xlu1 %1496 }
 0x190   : > { %v3252_v57 = vpop.f32.mrb[24].mxu1 }
 0x191   : > { %v1209_v58 = vadd.f32 %v3252_v57, %v1071_v46  ;;  %v1187_v59 = vpop.f32.mrb[25].mxu1 }
 0x192   : > { %v1203_v60 = vadd.f32 %v1187_v59, %v1065_v50  ;;  %v3253_v61 = vpop.f32.mrb[26].mxu1  ;;  %v1525_v59 = vsub.s32 0, %v3709_v15 }
 0x193   : > { %v1190_v62 = vpop.f32.mrb[27].mxu1  ;;  %v1529_v61 = vsub.s32 1, %v3709_v15 }
 0x194   : > { %v1206_v63 = vadd.f32 %v1190_v62, %v1068_v56 }
 0x198   : > { %v3258_v0 = vpop.f32.mrb[28].mxu1 }
 0x199   : > { %v732_v3 = vpop.f32.mrb[16].mxu0  ;;  %v1347_v4 = vadd.f32 %v3258_v0, %v1209_v58  ;;  %v1325_v5 = vpop.f32.mrb[29].mxu1 }
 0x19a   : > { %v793_v6 = vadd.f32 %v732_v3, %v655_v48  ;;  %v734_v7 = vpop.f32.mrb[17].mxu0  ;;  %v1341_v8 = vadd.f32 %v1325_v5, %v1203_v60  ;;  %v3259_v9 = vpop.f32.mrb[30].mxu1  ;;  %v3727_v5 = vrot.slane %v257_v20, %v1525_v59 }
 0x19b   : > { %v794_v10 = vadd.f32 %v734_v7, %v656_v52  ;;  %v736_v11 = vpop.f32.mrb[18].mxu0  ;;  %v1328_v12 = vpop.f32.mrb[31].mxu1  ;;  %v3729_v9 = vrot.slane %v257_v20, %v1529_v61 }
 0x19c   : > { %v737_v13 = vpop.f32.mrb[19].mxu0  ;;  %v1344_v14 = vadd.f32 %v1328_v12, %v1206_v63  ;;  %v1502_v12 = vpop.permute.xlu1 %1501 }
 0x1a0   : > { %v3264_v16 = vpop.f32.mrb[32].mxu1 }
 0x1a1   : > { %v3712_v18 = vadd.f32 %v3264_v16, %v1347_v4  ;;  %v1463_v19 = vpop.f32.mrb[33].mxu1 }
 0x1a2   : > { %v1479_v22 = vadd.f32 %v1463_v19, %v1341_v8  ;;  %v3265_v23 = vpop.f32.mrb[34].mxu1 }
 0x1a3   : > { %v1466_v24 = vpop.f32.mrb[35].mxu1 }
 0x1a4   : > { %v1482_v25 = vadd.f32 %v1466_v24, %v1344_v14  ;;  %v1506_v27 = vadd.f32 %v1492_v21, %v1479_v22  ;;  %v1512_v22 = vadd.f32 %v1502_v12, %v3712_v18  ;;  %v3487_v18 = vmov 0.0  }
 0x1a5   : > { %3298 = vmatprep.subr.bf16.mxu0 %v3487_v18  ;;  %3302 = vmatprep.mubr.msk.bf16.mxu0 %vm3488_vm9, %v3487_v18 }
 0x1a6   : > { %v1509_v29 = vadd.f32 %v1497_v28, %v1482_v25  ;;  %v1515_v30 = vmax.f32 %v1506_v27, 0.0 }
 0x1a8   : > { %v1518_v31 = vmax.f32 %v1509_v29, 0.0  ;;  %v1540_v32 = vmul.f32 %v3717_v26, %v1515_v30 }
 0x1a9   : > { %v870_v33 = vpop.f32.mrb[20].mxu0 }
 0x1aa   : > { %v931_v34 = vadd.f32 %v870_v33, %v793_v6  ;;  %v872_v35 = vpop.f32.mrb[21].mxu0  ;;  %v1543_v36 = vmul.f32 %v3717_v26, %v1518_v31 }
 0x1ab   : > { %v932_v37 = vadd.f32 %v872_v35, %v794_v10  ;;  %v874_v38 = vpop.f32.mrb[22].mxu0 }
 0x1ac   : > { %v875_v39 = vpop.f32.mrb[23].mxu0  ;;  %v3721_v40 = vpack.c.bf16 %v1543_v36, %v1540_v32  ;;  %v1521_v32 = vmax.f32 %v1512_v22, 0.0 }
 0x1ae   : > { %1573 = vrot.lane.b32.xlu1 %v3721_v40, %s3479_s29 }
 0x1b9   : > { %v1008_v41 = vpop.f32.mrb[24].mxu0 }
 0x1ba   : > { %v1069_v42 = vadd.f32 %v1008_v41, %v931_v34  ;;  %v1010_v43 = vpop.f32.mrb[25].mxu0 }
 0x1bb   : > { %v1070_v44 = vadd.f32 %v1010_v43, %v932_v37  ;;  %v1012_v45 = vpop.f32.mrb[26].mxu0  ;;  %v1546_v37 = vmul.f32 %v3717_v26, %v1521_v32 }
 0x1bc   : > { %v1013_v46 = vpop.f32.mrb[27].mxu0 }
 0x1bd   : > { %v3756_v41 = vpack.c.bf16 %v1546_v37, %v1546_v37 }
 0x1c9   : > { %v1146_v47 = vpop.f32.mrb[28].mxu0 }
 0x1ca   : > { %v1207_v48 = vadd.f32 %v1146_v47, %v1069_v42  ;;  %v1148_v49 = vpop.f32.mrb[29].mxu0  ;;  %v2690_v42 = vld [vmem:[%s4162_s5] sm:$0xff] }
 0x1cb   : > { %v1208_v50 = vadd.f32 %v1148_v49, %v1070_v44  ;;  %v1150_v51 = vpop.f32.mrb[30].mxu0 }
 0x1cc   : > { %v1151_v52 = vpop.f32.mrb[31].mxu0 }
 0x1d9   : > { %v1284_v53 = vpop.f32.mrb[32].mxu0 }
 0x1da   : > { %v1345_v54 = vadd.f32 %v1284_v53, %v1207_v48  ;;  %v1286_v55 = vpop.f32.mrb[33].mxu0 }
 0x1db   : > { %v1346_v56 = vadd.f32 %v1286_v55, %v1208_v50  ;;  %v1288_v57 = vpop.f32.mrb[34].mxu0 }
 0x1dc   : > { %v1289_v58 = vpop.f32.mrb[35].mxu0 }
 0x1e1   : > { %v1412_v60 = vpop.f32.mrb[0].mxu0 }
 0x1e2   : > { %v1504_v62 = vadd.f32 %v1492_v21, %v1412_v60  ;;  %v1414_v63 = vpop.f32.mrb[1].mxu0 }
 0x1e3   : > { %v1505_v0 = vadd.f32 %v1492_v21, %v1414_v63  ;;  %v1416_v3 = vpop.f32.mrb[2].mxu0 }
 0x1e4   : > { %v1513_v4 = vmax.f32 %v1504_v62, 0.0  ;;  %v1507_v6 = vadd.f32 %v1497_v28, %v1416_v3  ;;  %v1418_v7 = vpop.f32.mrb[3].mxu0  ;;  %v3450_v3 = vld [vmem:[%s4161_s4] sm:$0x3f]  }
 0x1e5   : > { %v1514_v8 = vmax.f32 %v1505_v0, 0.0  ;;  %v1508_v10 = vadd.f32 %v1497_v28, %v1418_v7 }
 0x1e6   : > { %v1516_v11 = vmax.f32 %v1507_v6, 0.0  ;;  %v1538_v14 = vmul.f32 %v3727_v5, %v1513_v4 }
 0x1e7   : > { %v1517_v13 = vmax.f32 %v1508_v10, 0.0  ;;  %v1539_v17 = vmul.f32 %v3729_v9, %v1514_v8  ;;  %v1701_v8 = vsel %vm1592_vm10, %v3756_v41, 0 }
 0x1e8   : > { %v1541_v16 = vmul.f32 %v3727_v5, %v1516_v11 }
 0x1e9   : > { %v1542_v19 = vmul.f32 %v3729_v9, %v1517_v13  ;;  %v1422_v21 = vpop.f32.mrb[36].mxu0 }
 0x1ea   : > { %v3736_v23 = vpack.c.bf16 %v1541_v16, %v1538_v14  ;;  %v1483_v24 = vadd.f32 %v1422_v21, %v1345_v54  ;;  %v1424_v20 = vpop.f32.mrb[37].mxu0  ;;  %v3449_v54 = vld [vmem:[%s4161_s4 + $0x8] sm:$0x3f]  }
 0x1eb   : > { %v3738_v25 = vpack.c.bf16 %v1542_v19, %v1539_v17  ;;  %v1484_v27 = vadd.f32 %v1424_v20, %v1346_v56  ;;  %v1426_v28 = vpop.f32.mrb[38].mxu0  ;;  %v3451_v19 = vld [vmem:[%s4161_s4 + $0x10] sm:$0x3f]  }
 0x1ec   : > { %v1510_v29 = vadd.f32 %v1502_v12, %v1483_v24  ;;  %v1427_v30 = vpop.f32.mrb[39].mxu0  ;;  %1569 = vrot.lane.b32.xlu0 %v3736_v23, %s3479_s29 }
 0x1ed   : > { %v1511_v31 = vadd.f32 %v1502_v12, %v1484_v27 }
 0x1ee   : > { %v1519_v33 = vmax.f32 %v1510_v29, 0.0 }
 0x1ef   : > { %v1520_v34 = vmax.f32 %v1511_v31, 0.0 }
 0x1f0   : > { %v1544_v35 = vmul.f32 %v3727_v5, %v1519_v33  ;;  %1571 = vrot.lane.b32.xlu0 %v3738_v25, %s3479_s29 }
 0x1f1   : > { %v1545_v36 = vmul.f32 %v3729_v9, %v1520_v34 }
 0x1f2   : > { %v3748_v38 = vpack.c.bf16 %v1544_v35, %v1544_v35  ;;  %v3955_v35 = vld [vmem:[%s4161_s4 + $0x28] sm:$0x3f]  }
 0x1f3   : > { %v3750_v39 = vpack.c.bf16 %v1545_v36, %v1545_v36 }
 0x1f4   : > { %1575 = vrot.lane.b32.xlu1 %v3748_v38, %s3479_s29  ;;  %v1695_v0 = vsel %vm1592_vm10, %v3748_v38, 0 }
 0x1f5   : > { %1577 = vrot.lane.b32.xlu0 %v3750_v39, %s3479_s29 }
 0x1f8   : > { %1579 = vrot.lane.b32.xlu1 %v3756_v41, %s3479_s29 }
 0x1f9   : > { %1797 = vrot.lane.b32.xlu0 %v3738_v25, %s3480_s30 }
 0x1fc   : > { %1799 = vrot.lane.b32.xlu1 %v3721_v40, %s3480_s30 }
 0x1fd   : > { %1795 = vrot.lane.b32.xlu0 %v3736_v23, %s3480_s30 }
 0x200   : > { %1801 = vrot.lane.b32.xlu1 %v3748_v38, %s3480_s30 }
 0x201   : > { %1803 = vrot.lane.b32.xlu0 %v3750_v39, %s3480_s30 }
 0x204   : > { %1805 = vrot.lane.b32.xlu1 %v3756_v41, %s3480_s30 }
 0x205   : > { %1926 = vrot.lane.b32.xlu0 %v3738_v25, %s3481_s7 }
 0x208   : > { %1928 = vrot.lane.b32.xlu1 %v3721_v40, %s3481_s7 }
 0x209   : > { %1924 = vrot.lane.b32.xlu0 %v3736_v23, %s3481_s7 }
 0x20c   : > { %1930 = vrot.lane.b32.xlu1 %v3748_v38, %s3481_s7 }
 0x20d   : > { %1932 = vrot.lane.b32.xlu0 %v3750_v39, %s3481_s7 }
 0x210   : > { %1934 = vrot.lane.b32.xlu1 %v3756_v41, %s3481_s7 }
 0x211   : > { %2055 = vrot.lane.b32.xlu0 %v3738_v25, %s3482_s8 }
 0x214   : > { %2057 = vrot.lane.b32.xlu1 %v3721_v40, %s3482_s8 }
 0x215   : > { %2053 = vrot.lane.b32.xlu0 %v3736_v23, %s3482_s8 }
 0x218   : > { %2059 = vrot.lane.b32.xlu1 %v3748_v38, %s3482_s8 }
 0x219   : > { %2061 = vrot.lane.b32.xlu0 %v3750_v39, %s3482_s8 }
 0x21c   : > { %2063 = vrot.lane.b32.xlu1 %v3756_v41, %s3482_s8 }
 0x21d   : > { %2184 = vrot.lane.b32.xlu0 %v3738_v25, %s3483_s9 }
 0x220   : > { %2186 = vrot.lane.b32.xlu1 %v3721_v40, %s3483_s9  ;;  %v1574_v44 = vpop.permute.xlu1 %1573 }
 0x221   : > { %2182 = vrot.lane.b32.xlu0 %v3736_v23, %s3483_s9 }
 0x224   : > { %2188 = vrot.lane.b32.xlu1 %v3748_v38, %s3483_s9 }
 0x225   : > { %2190 = vrot.lane.b32.xlu0 %v3750_v39, %s3483_s9 }
 0x228   : > { %2192 = vrot.lane.b32.xlu1 %v3756_v41, %s3483_s9 }
 0x229   : > { %2313 = vrot.lane.b32.xlu0 %v3738_v25, %s3484_s10 }
 0x22c   : > { %2315 = vrot.lane.b32.xlu1 %v3721_v40, %s3484_s10 }
 0x22d   : > { %2311 = vrot.lane.b32.xlu0 %v3736_v23, %s3484_s10 }
 0x230   : > { %2317 = vrot.lane.b32.xlu1 %v3748_v38, %s3484_s10 }
 0x231   : > { %2319 = vrot.lane.b32.xlu0 %v3750_v39, %s3484_s10 }
 0x234   : > { %2321 = vrot.lane.b32.xlu1 %v3756_v41, %s3484_s10 }
 0x235   : > { %2442 = vrot.lane.b32.xlu0 %v3738_v25, %s3485_s11 }
 0x238   : > { %2444 = vrot.lane.b32.xlu1 %v3721_v40, %s3485_s11 }
 0x239   : > { %2440 = vrot.lane.b32.xlu0 %v3736_v23, %s3485_s11 }
 0x23c   : > { %2446 = vrot.lane.b32.xlu1 %v3748_v38, %s3485_s11 }
 0x23d   : > { %2448 = vrot.lane.b32.xlu0 %v3750_v39, %s3485_s11 }
 0x240   : > { %2450 = vrot.lane.b32.xlu1 %v3756_v41, %s3485_s11 }
 0x241   : > { %2571 = vrot.lane.b32.xlu0 %v3738_v25, %s3486_s12 }
 0x244   : > { %2573 = vrot.lane.b32.xlu1 %v3721_v40, %s3486_s12 }
 0x245   : > { %2569 = vrot.lane.b32.xlu0 %v3736_v23, %s3486_s12 }
 0x248   : > { %2575 = vrot.lane.b32.xlu1 %v3748_v38, %s3486_s12  ;;  %v3453_v38 = vld [vmem:[%s4161_s4 + $0x18] sm:$0x3f]  }
 0x249   : > { %2577 = vrot.lane.b32.xlu0 %v3750_v39, %s3486_s12 }
 0x24c   : > { %2579 = vrot.lane.b32.xlu1 %v3756_v41, %s3486_s12 }
 0x24d   : > { %2694 = vperm.xlu0 %3425, %v2690_v42  }
 0x250   : > { %2763 = vrot.lane.b32.xlu1 %v3729_v9, %s3482_s8 }
 0x251   : > { %2765 = vrot.lane.b32.xlu0 %v3717_v26, %s3482_s8 }
 0x254   : > { %2761 = vrot.lane.b32.xlu1 %v3727_v5, %s3482_s8 }
 0x25e   : > { %v1570_v43 = vpop.permute.xlu0 %1569 }
 0x262   : > { %v1572_v45 = vpop.permute.xlu0 %1571 }
 0x263   : > { %v1581_v46 = vsel %vm292_vm1, %v1570_v43, %v1572_v45  ;;  %v1582_v47 = vsel %vm292_vm1, %v1572_v45, %v1574_v44 }
 0x264   : > { %1602 = vmatprep.subr.bf16.mxu1 %v1582_v47  ;;  %v3982_v47 = vld [vmem:[%s4161_s4 + $0x30] sm:$0x3f]  }
 0x265   : > { %1603 = vmatpush1.bf16.msra.mxu1 %v1581_v46 }
 0x266   : > { %v1576_v48 = vpop.permute.xlu1 %1575 }
 0x267   : > { %v1578_v49 = vpop.permute.xlu0 %1577 }
 0x268   : > { %v1583_v50 = vsel %vm292_vm1, %v1576_v48, %v1578_v49 }
 0x269   : > { %v1594_v53 = vsel %vm1592_vm10, %v1583_v50, 0 }
 0x26a   : > { %v1580_v51 = vpop.permute.xlu1 %1579 }
 0x26b   : > { %v1584_v26 = vsel %vm292_vm1, %v1578_v49, %v1580_v51  ;;  %v1798_v52 = vpop.permute.xlu0 %1797  ;;  %v1600_v59 = vsel %vm1592_vm10, %v1580_v51, 0 }
 0x26c   : > { %3106 = vmatprep.subr.msk.bf16.mxu1 %vm1592_vm10, %v1584_v26 }
 0x26d   : > { %1605 = vmatpush1.bf16.msra.mxu1 %v1594_v53 }
 0x26e   : > { %v1800_v55 = vpop.permute.xlu1 %1799  ;;  %3266 = vmatprep.subr.bf16.mxu1 %v3487_v18 }
 0x26f   : > { %v1796_v56 = vpop.permute.xlu0 %1795  ;;  %v1808_v9 = vsel %vm538_vm2, %v1798_v52, %v1800_v55 }
 0x270   : > { %3107 = vmatmul.mubr.msk.bf16.vlgmr.msra.gmra.mrb[36].mxu1 %vm1588_vm11, %v3449_v54 }
 0x271   : > { %3267 = vmatpush3.bf16.msra.mxu1 %v1574_v44  ;;  %3270 = vmatprep.mubr.msk.bf16.mxu1 %vm3488_vm9, %v3487_v18 }
 0x272   : > { %v1802_v57 = vpop.permute.xlu1 %1801  ;;  %3268 = vmatprep.subr.bf16.mxu1 %v3487_v18 }
 0x273   : > { %v1804_v58 = vpop.permute.xlu0 %1803 }
 0x274   : > { %v1809_v12 = vsel %vm538_vm2, %v1802_v57, %v1804_v58 }
 0x275   : > { %3269 = vmatpush3.bf16.msra.mxu1 %v1600_v59  ;;  %v1818_v17 = vsel %vm1592_vm10, %v1809_v12, 0 }
 0x276   : > { %1703 = vmatprep.subr.bf16.mxu1 %v3738_v25  ;;  %v1806_v60 = vpop.permute.xlu1 %1805 }
 0x277   : > { %v1927_v61 = vpop.permute.xlu0 %1926  ;;  %v1810_v13 = vsel %vm538_vm2, %v1804_v58, %v1806_v60  ;;  %v1824_v25 = vsel %vm1592_vm10, %v1806_v60, 0 }
 0x278   : > { %3271 = vmatmul.mubr.msk.bf16.vlgmr.msra.gmra.mrb[40].mxu1 %vm1588_vm11, %v3449_v54 }
 0x279   : > { %1704 = vmatpush1.bf16.msra.mxu1 %v3736_v23  ;;  %1735 = vmatprep.mubr.bf16.mxu1 %v3478_v1  ;;  %v3924_v23 = vld [vmem:[%s4161_s4 + $0x20] sm:$0x3f]  }
 0x27a   : > { %3110 = vmatprep.subr.msk.bf16.mxu1 %vm1592_vm10, %v3750_v39  ;;  %v3876_v62 = vpop.permute.xlu1 %1928 }
 0x27b   : > { %v1925_v63 = vpop.permute.xlu0 %1924  ;;  %v1937_v27 = vsel %vm676_vm3, %v1927_v61, %v3876_v62 }
 0x27c   : > { %v1936_v30 = vsel %vm676_vm3, %v1925_v63, %v1927_v61  ;;  %v3456_v61 = vld [vmem:[%s4161_s4 + $0x38] sm:$0x3f]  }
 0x27d   : > { %1706 = vmatpush1.bf16.msra.mxu1 %v1695_v0 }
 0x27e   : > { %v1931_v4 = vpop.permute.xlu1 %1930  ;;  %3274 = vmatprep.subr.bf16.mxu1 %v3487_v18 }
 0x27f   : > { %v1933_v5 = vpop.permute.xlu0 %1932 }
 0x280   : > { %3111 = vmatmul.mubr.msk.bf16.vlgmr.msra.gmra.mrb[36].mxu1 %vm1588_vm11, %v3450_v3  ;;  %v1938_v31 = vsel %vm676_vm3, %v1931_v4, %v1933_v5 }
 0x281   : > { %3275 = vmatpush3.bf16.msra.mxu1 %v3721_v40  ;;  %3278 = vmatprep.mubr.msk.bf16.mxu1 %vm3488_vm9, %v3487_v18  ;;  %v1807_v40 = vsel %vm538_vm2, %v1796_v56, %v1798_v52  ;;  %v1947_v36 = vsel %vm1592_vm10, %v1938_v31, 0 }
 0x282   : > { %v3888_v6 = vpop.permute.xlu1 %1934  ;;  %3276 = vmatprep.subr.bf16.mxu1 %v3487_v18 }
 0x283   : > { %v3891_v7 = vpop.permute.xlu0 %2055  ;;  %v1939_v32 = vsel %vm676_vm3, %v1933_v5, %v3888_v6  ;;  %v1953_v43 = vsel %vm1592_vm10, %v3888_v6, 0 }
 0x285   : > { %3277 = vmatpush3.bf16.msra.mxu1 %v1701_v8 }
 0x286   : > { %1826 = vmatprep.subr.bf16.mxu1 %v1808_v9  ;;  %v3896_v10 = vpop.permute.xlu1 %2057 }
 0x287   : > { %v3898_v11 = vpop.permute.xlu0 %2053  ;;  %3299 = vmatpush3.bf16.msra.mxu0 %v3896_v10  ;;  %v2066_v44 = vsel %vm814_vm4, %v3891_v7, %v3896_v10 }
 0x288   : > { %3279 = vmatmul.mubr.msk.bf16.vlgmr.msra.gmra.mrb[44].mxu1 %vm1588_vm11, %v3450_v3  ;;  %3300 = vmatprep.subr.bf16.mxu0 %v3487_v18  ;;  %v2065_v48 = vsel %vm814_vm4, %v3898_v11, %v3891_v7 }
 0x289   : > { %1827 = vmatpush1.bf16.msra.mxu1 %v1807_v40  ;;  %1858 = vmatprep.mubr.bf16.mxu1 %v3478_v1 }
 0x28a   : > { %3116 = vmatprep.subr.msk.bf16.mxu1 %vm1592_vm10, %v1810_v13  ;;  %v3908_v14 = vpop.permute.xlu1 %2059 }
 0x28b   : > { %v3910_v16 = vpop.permute.xlu0 %2061 }
 0x28c   : > { %v2067_v50 = vsel %vm814_vm4, %v3908_v14, %v3910_v16 }
 0x28d   : > { %1829 = vmatpush1.bf16.msra.mxu1 %v1818_v17  ;;  %v2076_v52 = vsel %vm1592_vm10, %v2067_v50, 0 }
 0x28e   : > { %v3916_v21 = vpop.permute.xlu1 %2063  ;;  %3282 = vmatprep.subr.bf16.mxu1 %v3487_v18 }
 0x28f   : > { %v2082_v22 = vsel %vm1592_vm10, %v3916_v21, 0  ;;  %v3926_v24 = vpop.permute.xlu0 %2184  ;;  %v2068_v51 = vsel %vm814_vm4, %v3910_v16, %v3916_v21 }
 0x290   : > { %3117 = vmatmul.mubr.msk.bf16.vlgmr.msra.gmra.mrb[36].mxu1 %vm1588_vm11, %v3451_v19  ;;  %3301 = vmatpush3.bf16.msra.mxu0 %v2082_v22 }
 0x291   : > { %3283 = vmatpush3.bf16.msra.mxu1 %v1800_v55  ;;  %3306 = vmatprep.subr.bf16.mxu0 %v3487_v18 }
 0x292   : > { %v3930_v20 = vpop.permute.xlu1 %2186  ;;  %3284 = vmatprep.subr.bf16.mxu1 %v3487_v18  ;;  %3286 = vmatprep.mubr.msk.bf16.mxu1 %vm3488_vm9, %v3487_v18 }
 0x293   : > { %3303 = vmatmul.mubr.msk.bf16.vlgmr.msra.gmra.mrb[40].mxu0 %vm1588_vm11, %v3924_v23  ;;  %v2183_v28 = vpop.permute.xlu0 %2182  ;;  %v2195_v53 = vsel %vm952_vm5, %v3926_v24, %v3930_v20 }
 0x294   : > { %3307 = vmatpush3.bf16.msra.mxu0 %v3930_v20  ;;  %3310 = vmatprep.mubr.msk.bf16.mxu0 %vm3488_vm9, %v3487_v18  ;;  %v2194_v56 = vsel %vm952_vm5, %v2183_v28, %v3926_v24 }
 0x295   : > { %3285 = vmatpush3.bf16.msra.mxu1 %v1824_v25  ;;  %3308 = vmatprep.subr.bf16.mxu0 %v3487_v18 }
 0x296   : > { %1955 = vmatprep.subr.bf16.mxu1 %v1937_v27  ;;  %v2189_v29 = vpop.permute.xlu1 %2188 }
 0x297   : > { %v2191_v37 = vpop.permute.xlu0 %2190 }
 0x298   : > { %3287 = vmatmul.mubr.msk.bf16.vlgmr.msra.gmra.mrb[48].mxu1 %vm1588_vm11, %v3451_v19  ;;  %v2196_v57 = vsel %vm952_vm5, %v2189_v29, %v2191_v37 }
 0x299   : > { %1956 = vmatpush1.bf16.msra.mxu1 %v1936_v30  ;;  %1987 = vmatprep.mubr.bf16.mxu1 %v3478_v1 }
 0x29a   : > { %3122 = vmatprep.subr.msk.bf16.mxu1 %vm1592_vm10, %v1939_v32  ;;  %v2193_v33 = vpop.permute.xlu1 %2192 }
 0x29b   : > { %v2211_v34 = vsel %vm1592_vm10, %v2193_v33, 0  ;;  %v2314_v41 = vpop.permute.xlu0 %2313  ;;  %v2197_v58 = vsel %vm952_vm5, %v2191_v37, %v2193_v33 }
 0x29c   : > { %3309 = vmatpush3.bf16.msra.mxu0 %v2211_v34 }
 0x29d   : > { %1958 = vmatpush1.bf16.msra.mxu1 %v1947_v36  ;;  %3314 = vmatprep.subr.bf16.mxu0 %v3487_v18 }
 0x29e   : > { %v2316_v39 = vpop.permute.xlu1 %2315  ;;  %3290 = vmatprep.subr.bf16.mxu1 %v3487_v18 }
 0x29f   : > { %3311 = vmatmul.mubr.msk.bf16.vlgmr.msra.gmra.mrb[44].mxu0 %vm1588_vm11, %v3955_v35  ;;  %v2312_v49 = vpop.permute.xlu0 %2311  ;;  %v2324_v0 = vsel %vm1090_vm6, %v2314_v41, %v2316_v39 }
 0x2a0   : > { %3123 = vmatmul.mubr.msk.bf16.vlgmr.msra.gmra.mrb[36].mxu1 %vm1588_vm11, %v3453_v38  ;;  %3315 = vmatpush3.bf16.msra.mxu0 %v2316_v39  ;;  %v2323_v6 = vsel %vm1090_vm6, %v2312_v49, %v2314_v41 }
 0x2a1   : > { %3291 = vmatpush3.bf16.msra.mxu1 %v3876_v62  ;;  %3294 = vmatprep.mubr.msk.bf16.mxu1 %vm3488_vm9, %v3487_v18  ;;  %v2205_v62 = vsel %vm1592_vm10, %v2196_v57, 0 }
 0x2a2   : > { %v2318_v42 = vpop.permute.xlu1 %2317  ;;  %3292 = vmatprep.subr.bf16.mxu1 %v3487_v18  ;;  %3316 = vmatprep.subr.bf16.mxu0 %v3487_v18 }
 0x2a3   : > { %3318 = vmatprep.mubr.msk.bf16.mxu0 %vm3488_vm9, %v3487_v18  ;;  %v2320_v54 = vpop.permute.xlu0 %2319 }
 0x2a4   : > { %v2325_v7 = vsel %vm1090_vm6, %v2318_v42, %v2320_v54 }
 0x2a5   : > { %3293 = vmatpush3.bf16.msra.mxu1 %v1953_v43  ;;  %v2334_v11 = vsel %vm1592_vm10, %v2325_v7, 0 }
 0x2a6   : > { %2084 = vmatprep.subr.bf16.mxu1 %v2066_v44  ;;  %v2322_v45 = vpop.permute.xlu1 %2321 }
 0x2a7   : > { %v2340_v46 = vsel %vm1592_vm10, %v2322_v45, 0  ;;  %v2443_v63 = vpop.permute.xlu0 %2442  ;;  %v2326_v8 = vsel %vm1090_vm6, %v2320_v54, %v2322_v45 }
 0x2a8   : > { %3295 = vmatmul.mubr.msk.bf16.vlgmr.msra.gmra.mrb[52].mxu1 %vm1588_vm11, %v3453_v38  ;;  %3317 = vmatpush3.bf16.msra.mxu0 %v2340_v46 }
 0x2a9   : > { %2085 = vmatpush1.bf16.msra.mxu1 %v2065_v48  ;;  %3322 = vmatprep.subr.bf16.mxu0 %v3487_v18 }
 0x2aa   : > { %3128 = vmatprep.subr.msk.bf16.mxu1 %vm1592_vm10, %v2068_v51  ;;  %v2445_v26 = vpop.permute.xlu1 %2444  ;;  %2116 = vmatprep.mubr.bf16.mxu1 %v3478_v1 }
 0x2ab   : > { %3319 = vmatmul.mubr.msk.bf16.vlgmr.msra.gmra.mrb[48].mxu0 %vm1588_vm11, %v3982_v47  ;;  %v2441_v4 = vpop.permute.xlu0 %2440  ;;  %v2453_v12 = vsel %vm1228_vm7, %v2443_v63, %v2445_v26 }
 0x2ac   : > { %3323 = vmatpush3.bf16.msra.mxu0 %v2445_v26  ;;  %3326 = vmatprep.mubr.msk.bf16.mxu0 %vm3488_vm9, %v3487_v18  ;;  %v2452_v14 = vsel %vm1228_vm7, %v2441_v4, %v2443_v63 }
 0x2ad   : > { %2087 = vmatpush1.bf16.msra.mxu1 %v2076_v52  ;;  %3324 = vmatprep.subr.bf16.mxu0 %v3487_v18 }
 0x2ae   : > { %2213 = vmatprep.subr.bf16.mxu1 %v2195_v53  ;;  %v2447_v55 = vpop.permute.xlu1 %2446 }
 0x2af   : > { %v2449_v40 = vpop.permute.xlu0 %2448 }
 0x2b0   : > { %3129 = vmatmul.mubr.msk.bf16.vlgmr.msra.gmra.mrb[36].mxu1 %vm1588_vm11, %v3924_v23  ;;  %v2454_v16 = vsel %vm1228_vm7, %v2447_v55, %v2449_v40 }
 0x2b1   : > { %2214 = vmatpush1.bf16.msra.mxu1 %v2194_v56  ;;  %2245 = vmatprep.mubr.bf16.mxu1 %v3478_v1  ;;  %v2463_v19 = vsel %vm1592_vm10, %v2454_v16, 0 }
 0x2b2   : > { %3134 = vmatprep.subr.msk.bf16.mxu1 %vm1592_vm10, %v2197_v58  ;;  %v2451_v59 = vpop.permute.xlu1 %2450 }
 0x2b3   : > { %v2469_v60 = vsel %vm1592_vm10, %v2451_v59, 0  ;;  %v2572_v13 = vpop.permute.xlu0 %2571  ;;  %v2455_v17 = vsel %vm1228_vm7, %v2449_v40, %v2451_v59 }
 0x2b4   : > { %3325 = vmatpush3.bf16.msra.mxu0 %v2469_v60 }
 0x2b5   : > { %2216 = vmatpush1.bf16.msra.mxu1 %v2205_v62  ;;  %3330 = vmatprep.subr.bf16.mxu0 %v3487_v18 }
 0x2b6   : > { %2342 = vmatprep.subr.bf16.mxu1 %v2324_v0  ;;  %v2574_v3 = vpop.permute.xlu1 %2573 }
 0x2b7   : > { %3327 = vmatmul.mubr.msk.bf16.vlgmr.msra.gmra.mrb[52].mxu0 %vm1588_vm11, %v3456_v61  ;;  %v2570_v21 = vpop.permute.xlu0 %2569  ;;  %v2582_v22 = vsel %vm1366_vm8, %v2572_v13, %v2574_v3 }
 0x2b8   : > { %3331 = vmatpush3.bf16.msra.mxu0 %v2574_v3  ;;  %3334 = vmatprep.mubr.msk.bf16.mxu0 %vm3488_vm9, %v3487_v18  ;;  %v2581_v24 = vsel %vm1366_vm8, %v2570_v21, %v2572_v13  ;;  %vm2920_vm9 = vcmask 244736  }
 0x2b9   : > { %3332 = vmatprep.subr.bf16.mxu0 %v3487_v18  ;;  %v3457_v18 = vld [vmem:[%s4161_s4 + $0x40] sm:$0x3f]  }
 0x2ba   : > { %v2576_v5 = vpop.permute.xlu1 %2575 }
 0x2bb   : > { %v2578_v23 = vpop.permute.xlu0 %2577 }
 0x2bc   : > { %3135 = vmatmul.mubr.msk.bf16.vlgmr.msra.gmra.mrb[36].mxu1 %vm1588_vm11, %v3955_v35  ;;  %v2583_v20 = vsel %vm1366_vm8, %v2576_v5, %v2578_v23 }
 0x2bd   : > { %2343 = vmatpush1.bf16.msra.mxu1 %v2323_v6  ;;  %2374 = vmatprep.mubr.bf16.mxu1 %v3478_v1  ;;  %v2592_v27 = vsel %vm1592_vm10, %v2583_v20, 0 }
 0x2be   : > { %3140 = vmatprep.subr.msk.bf16.mxu1 %vm1592_vm10, %v2326_v8  ;;  %v2580_v9 = vpop.permute.xlu1 %2579 }
 0x2bf   : > { %v2598_v10 = vsel %vm1592_vm10, %v2580_v9, 0  ;;  %v2584_v25 = vsel %vm1366_vm8, %v2578_v23, %v2580_v9 }
 0x2c0   : > { %3333 = vmatpush3.bf16.msra.mxu0 %v2598_v10 }
 0x2c1   : > { %2345 = vmatpush1.bf16.msra.mxu1 %v2334_v11 }
 0x2c2   : > { %2471 = vmatprep.subr.bf16.mxu1 %v2453_v12 }
 0x2c3   : > { %3335 = vmatmul.mubr.msk.bf16.vlgmr.msra.gmra.mrb[56].mxu0 %vm1588_vm11, %v3457_v18 }
 0x2c8   : > { %3141 = vmatmul.mubr.msk.bf16.vlgmr.msra.gmra.mrb[36].mxu1 %vm1588_vm11, %v3982_v47 }
 0x2c9   : > { %2472 = vmatpush1.bf16.msra.mxu1 %v2452_v14  ;;  %2503 = vmatprep.mubr.bf16.mxu1 %v3478_v1 }
 0x2ca   : > { %3146 = vmatprep.subr.msk.bf16.mxu1 %vm1592_vm10, %v2455_v17 }
 0x2cc   : > { %v2695_v12 = vpop.permute.xlu0 %2694 }
 0x2cd   : > { %2474 = vmatpush1.bf16.msra.mxu1 %v2463_v19 }
 0x2ce   : > { %2600 = vmatprep.subr.bf16.mxu1 %v2582_v22 }
 0x2d4   : > { %3147 = vmatmul.mubr.msk.bf16.vlgmr.msra.gmra.mrb[36].mxu1 %vm1588_vm11, %v3456_v61 }
 0x2d5   : > { %2601 = vmatpush1.bf16.msra.mxu1 %v2581_v24  ;;  %2632 = vmatprep.mubr.bf16.mxu1 %v3478_v1 }
 0x2d6   : > { %3152 = vmatprep.subr.msk.bf16.mxu1 %vm1592_vm10, %v2584_v25  ;;  %vm2788_vm10 = vcmask 154624  }
 0x2d9   : > { %2603 = vmatpush1.bf16.msra.mxu1 %v2592_v27 }
 0x2e0   : > { %3153 = vmatmul.mubr.msk.bf16.vlgmr.msra.gmra.mrb[36].mxu1 %vm1588_vm11, %v3457_v18 }
 0x34b   : > { %v1679_v28 = vpop.f32.mrb[40].mxu1 }
 0x34c   : > { %v3272_v29 = vpop.f32.mrb[41].mxu1 }
 0x34d   : > { %v1682_v30 = vpop.f32.mrb[42].mxu1 }
 0x34e   : > { %v3273_v31 = vpop.f32.mrb[43].mxu1 }
 0x35b   : > { %v1780_v32 = vpop.f32.mrb[44].mxu1 }
 0x35c   : > { %v1781_v33 = vadd.f32 %v1780_v32, %v1679_v28  ;;  %v3280_v34 = vpop.f32.mrb[45].mxu1 }
 0x35d   : > { %v1783_v35 = vpop.f32.mrb[46].mxu1 }
 0x35e   : > { %v1784_v36 = vadd.f32 %v1783_v35, %v1682_v30  ;;  %v3281_v37 = vpop.f32.mrb[47].mxu1  ;;  %v2766_v30 = vpop.permute.xlu0 %2765 }
 0x366   : > { %v2161_v38 = vpop.f32.mrb[40].mxu0 }
 0x367   : > { %v3304_v39 = vpop.f32.mrb[41].mxu0 }
 0x368   : > { %v2164_v1 = vpop.f32.mrb[42].mxu0 }
 0x369   : > { %v3305_v41 = vpop.f32.mrb[43].mxu0 }
 0x36b   : > { %v1903_v42 = vpop.f32.mrb[48].mxu1 }
 0x36c   : > { %v1912_v43 = vadd.f32 %v1903_v42, %v1781_v33  ;;  %v3288_v44 = vpop.f32.mrb[49].mxu1 }
 0x36d   : > { %v1906_v45 = vpop.f32.mrb[50].mxu1  ;;  %v2764_v44 = vpop.permute.xlu1 %2763 }
 0x36e   : > { %v1915_v46 = vadd.f32 %v1906_v45, %v1784_v36  ;;  %v3289_v47 = vpop.f32.mrb[51].mxu1 }
 0x36f   : > { %v2769_v47 = vsel %vm814_vm4, %v2764_v44, %v2766_v30 }
 0x371   : > { %v2762_v45 = vpop.permute.xlu1 %2761 }
 0x372   : > { %v2290_v48 = vpop.f32.mrb[44].mxu0 }
 0x373   : > { %v3312_v49 = vpop.f32.mrb[45].mxu0 }
 0x374   : > { %v2293_v50 = vpop.f32.mrb[46].mxu0 }
 0x375   : > { %v3313_v51 = vpop.f32.mrb[47].mxu0 }
 0x376   : > { %v2768_v51 = vsel %vm814_vm4, %v2762_v45, %v2764_v44  ;;  %vm2794_vm4 = vcmask 400384  }
 0x37b   : > { %v2032_v26 = vpop.f32.mrb[52].mxu1 }
 0x37c   : > { %v2041_v52 = vadd.f32 %v2032_v26, %v1912_v43  ;;  %v3296_v53 = vpop.f32.mrb[53].mxu1 }
 0x37d   : > { %v2035_v54 = vpop.f32.mrb[54].mxu1 }
 0x37e   : > { %v2044_v55 = vadd.f32 %v2035_v54, %v1915_v46  ;;  %v2170_v56 = vadd.f32 %v2161_v38, %v2041_v52  ;;  %v3297_v57 = vpop.f32.mrb[55].mxu1  ;;  %v2419_v58 = vpop.f32.mrb[48].mxu0 }
 0x37f   : > { %v3320_v59 = vpop.f32.mrb[49].mxu0 }
 0x380   : > { %v2299_v60 = vadd.f32 %v2290_v48, %v2170_v56  ;;  %v2173_v61 = vadd.f32 %v2164_v1, %v2044_v55  ;;  %v2422_v62 = vpop.f32.mrb[50].mxu0 }
 0x381   : > { %v3321_v63 = vpop.f32.mrb[51].mxu0 }
 0x382   : > { %v2302_v0 = vadd.f32 %v2293_v50, %v2173_v61  ;;  %v2428_v3 = vadd.f32 %v2419_v58, %v2299_v60 }
 0x384   : > { %v2431_v4 = vadd.f32 %v2422_v62, %v2302_v0 }
 0x38a   : > { %v2548_v5 = vpop.f32.mrb[52].mxu0 }
 0x38b   : > { %v2557_v6 = vadd.f32 %v2548_v5, %v2428_v3  ;;  %v3328_v7 = vpop.f32.mrb[53].mxu0  ;;  %v2691_v3 = vld [vmem:[%s4162_s5 + $0x8] sm:$0x7] }
 0x38c   : > { %v2551_v8 = vpop.f32.mrb[54].mxu0 }
 0x38d   : > { %v2560_v9 = vadd.f32 %v2551_v8, %v2431_v4  ;;  %v3329_v10 = vpop.f32.mrb[55].mxu0 }
 0x396   : > { %v2677_v18 = vpop.f32.mrb[56].mxu0 }
 0x397   : > { %v2686_v11 = vadd.f32 %v2677_v18, %v2557_v6  ;;  %v3336_v40 = vpop.f32.mrb[57].mxu0 }
 0x398   : > { %v2680_v13 = vpop.f32.mrb[58].mxu0 }
 0x399   : > { %v2704_v14 = vadd.f32 %v2695_v12, %v2686_v11  ;;  %v4056_v16 = vadd.f32 %v2680_v13, %v2560_v9  ;;  %v3337_v17 = vpop.f32.mrb[59].mxu0 }
 0x39b   : > { %v2710_v19 = vsub.f32 0.0, %v2704_v14 }
 0x39d   : > { %v2718_v21 = vmul.f32 1.442695, %v2710_v19 }
 0x39f   : > { %3458 = vpow2.f32 %v2718_v21 }
 0x3a9   : > { %v3459_v22 = vpop.eup %3458 }
 0x3aa   : > { %v2728_v23 = vadd.f32 1.0, %v3459_v22 }
 0x3ac   : > { %3460 = vrcp.f32 %v2728_v23 }
 0x3b3   : > { %v2634_v24 = vpop.f32.mrb[36].mxu1 }
 0x3b4   : > { %v2702_v20 = vadd.f32 %v2695_v12, %v2634_v24  ;;  %v2636_v25 = vpop.f32.mrb[37].mxu1 }
 0x3b5   : > { %v2703_v28 = vadd.f32 %v2695_v12, %v2636_v25  ;;  %v4066_v29 = vpop.f32.mrb[38].mxu1 }
 0x3b6   : > { %v3461_v31 = vpop.eup %3460  ;;  %v2708_v32 = vsub.f32 0.0, %v2702_v20  ;;  %v4073_v33 = vpop.f32.mrb[39].mxu1 }
 0x3b7   : > { %v2709_v34 = vsub.f32 0.0, %v2703_v28  ;;  %v2757_v35 = vsel %vm4062_vm0, %v3461_v31, %v2704_v14 }
 0x3b8   : > { %v2714_v36 = vmul.f32 1.442695, %v2708_v32  ;;  %v4077_v37 = vmul.f32 %v2766_v30, %v2757_v35  ;;  %2921 = vst.msk [vmem:[%s4071_s20 + $0x10] sm:$0xff] %vm2920_vm9, %v2757_v35 }
 0x3b9   : > { %v2716_v38 = vmul.f32 1.442695, %v2709_v34 }
 0x3ba   : > { %3462 = vpow2.f32 %v2714_v36  ;;  %v2781_v39 = vrot.slane %v4077_v37, 1 }
 0x3bb   : > { %3464 = vpow2.f32 %v2716_v38 }
 0x3bc   : > { %2786 = vrot.lane.b32.xlu1 %v2781_v39, %s3489_s22 }
 0x3c4   : > { %v3463_v1 = vpop.eup %3462 }
 0x3c5   : > { %v3465_v41 = vpop.eup %3464  ;;  %v2726_v42 = vadd.f32 1.0, %v3463_v1 }
 0x3c6   : > { %v2727_v43 = vadd.f32 1.0, %v3465_v41 }
 0x3c7   : > { %3466 = vrcp.f32 %v2726_v42 }
 0x3c8   : > { %3468 = vrcp.f32 %v2727_v43 }
 0x3d1   : > { %v3467_v46 = vpop.eup %3466 }
 0x3d2   : > { %v3469_v48 = vpop.eup %3468  ;;  %v2755_v49 = vsel %vm4062_vm0, %v3467_v46, %v2702_v20 }
 0x3d3   : > { %v2756_v50 = vsel %vm4062_vm0, %v3469_v48, %v2703_v28  ;;  %2918 = vst [vmem:[%s4071_s20] sm:$0xff] %v2755_v49  ;;  %v4091_v52 = vmul.f32 %v2768_v51, %v2755_v49 }
 0x3d4   : > { %2919 = vst [vmem:[%s4071_s20 + $0x8] sm:$0xff] %v2756_v50  ;;  %v4089_v26 = vmul.f32 %v2769_v47, %v2756_v50 }
 0x3d5   : > { %v2779_v54 = vrot.slane %v4091_v52, 1 }
 0x3d6   : > { %v2780_v53 = vrot.slane %v4089_v26, 1 }
 0x3d8   : > { %2784 = vrot.lane.b32.xlu0 %v2780_v53, %s3489_s22 }
 0x3dc   : > { %2782 = vrot.lane.b32.xlu0 %v2779_v54, %s3489_s22 }
 0x42e   : > { %v2787_v61 = vpop.permute.xlu1 %2786 }
 0x44a   : > { %v2785_v55 = vpop.permute.xlu0 %2784 }
 0x44b   : > { %v2790_v62 = vsel %vm2788_vm10, %v2785_v55, %v2787_v61 }
 0x44c   : > { %v2795_v63 = vsel %vm2794_vm4, %v2790_v62, 0.0 }
 0x44d   : > { %v2800_v0 = vrot.slane %v2795_v63, 7 }
 0x44e   : > { %v2783_v56 = vpop.permute.xlu0 %2782 }
 0x44f   : > { %v2793_v57 = vsel %vm2788_vm10, 0.0, %v2783_v56  ;;  %v2789_v59 = vsel %vm2788_vm10, %v2783_v56, %v2785_v55  ;;  %v2806_v28 = vmax.f32 %v4077_v37, %v2800_v0 }
 0x450   : > { %v2798_v58 = vrot.slane %v2793_v57, 7  ;;  %v2799_v60 = vrot.slane %v2789_v59, 7  ;;  %v3490_v57 = vmov 1966171168  }
 0x452   : > { %2822 = vrot.lane.b32.xlu0 %v2798_v58, %s3480_s30  ;;  %2807 = vrot.lane.b32.xlu1 %v2798_v58, %s3479_s29  ;;  %v2804_v40 = vmax.f32 %v4091_v52, %v2798_v58  ;;  %v2805_v32 = vmax.f32 %v4089_v26, %v2799_v60 }
 0x456   : > { %2852 = vrot.lane.b32.xlu0 %v2798_v58, %s3483_s9  ;;  %2837 = vrot.lane.b32.xlu1 %v2798_v58, %s3481_s7 }
 0x45a   : > { %2882 = vrot.lane.b32.xlu0 %v2798_v58, %s3485_s11  ;;  %2867 = vrot.lane.b32.xlu1 %v2798_v58, %s3484_s10 }
 0x45e   : > { %2897 = vrot.lane.b32.xlu1 %v2798_v58, %s3486_s12  ;;  %2809 = vrot.lane.b32.xlu0 %v2799_v60, %s3479_s29  ;;  %v2931_v58 = vunpack.c.l.s4 %v3490_v57 }
 0x462   : > { %2824 = vrot.lane.b32.xlu1 %v2799_v60, %s3480_s30  ;;  %2839 = vrot.lane.b32.xlu0 %v2799_v60, %s3481_s7 }
 0x466   : > { %2854 = vrot.lane.b32.xlu1 %v2799_v60, %s3483_s9  ;;  %2869 = vrot.lane.b32.xlu0 %v2799_v60, %s3484_s10 }
 0x46a   : > { %2884 = vrot.lane.b32.xlu1 %v2799_v60, %s3485_s11  ;;  %2826 = vrot.lane.b32.xlu0 %v2800_v0, %s3480_s30 }
 0x46e   : > { %2856 = vrot.lane.b32.xlu0 %v2800_v0, %s3483_s9  ;;  %2811 = vrot.lane.b32.xlu1 %v2800_v0, %s3479_s29 }
 0x472   : > { %2886 = vrot.lane.b32.xlu0 %v2800_v0, %s3485_s11  ;;  %2841 = vrot.lane.b32.xlu1 %v2800_v0, %s3481_s7 }
 0x476   : > { %2899 = vrot.lane.b32.xlu0 %v2799_v60, %s3486_s12  ;;  %2871 = vrot.lane.b32.xlu1 %v2800_v0, %s3484_s10 }
 0x47a   : > { %2699 = vperm.xlu0 %3425, %v2691_v3   ;;  %2901 = vrot.lane.b32.xlu1 %v2800_v0, %s3486_s12 }
 0x4c4   : > { %v2823_v4 = vpop.permute.xlu0 %2822  ;;  %v2808_v5 = vpop.permute.xlu1 %2807 }
 0x4c8   : > { %v2853_v6 = vpop.permute.xlu0 %2852  ;;  %v2838_v7 = vpop.permute.xlu1 %2837 }
 0x4cc   : > { %v2883_v8 = vpop.permute.xlu0 %2882  ;;  %v2868_v9 = vpop.permute.xlu1 %2867 }
 0x4d0   : > { %v2810_v10 = vpop.permute.xlu0 %2809  ;;  %v2898_v18 = vpop.permute.xlu1 %2897 }
 0x4d1   : > { %v2814_v11 = vsel %vm292_vm1, %v2808_v5, %v2810_v10  ;;  %v2932_v5 = vunpack.c.0.s8 %v2931_v58 }
 0x4d2   : > { %v2819_v17 = vmax.f32 %v2804_v40, %v2814_v11 }
 0x4d4   : > { %v2840_v12 = vpop.permute.xlu0 %2839  ;;  %v2825_v13 = vpop.permute.xlu1 %2824 }
 0x4d5   : > { %v2829_v14 = vsel %vm538_vm2, %v2823_v4, %v2825_v13  ;;  %v2844_v23 = vsel %vm676_vm3, %v2838_v7, %v2840_v12 }
 0x4d6   : > { %v2834_v19 = vmax.f32 %v2819_v17, %v2829_v14 }
 0x4d8   : > { %v2870_v21 = vpop.permute.xlu0 %2869  ;;  %v2855_v22 = vpop.permute.xlu1 %2854  ;;  %v2849_v24 = vmax.f32 %v2834_v19, %v2844_v23 }
 0x4d9   : > { %v2859_v27 = vsel %vm952_vm5, %v2853_v6, %v2855_v22  ;;  %v2874_v39 = vsel %vm1090_vm6, %v2868_v9, %v2870_v21 }
 0x4da   : > { %v2864_v30 = vmax.f32 %v2849_v24, %v2859_v27 }
 0x4dc   : > { %v2827_v20 = vpop.permute.xlu0 %2826  ;;  %v2885_v25 = vpop.permute.xlu1 %2884  ;;  %v2879_v42 = vmax.f32 %v2864_v30, %v2874_v39 }
 0x4dd   : > { %v2830_v1 = vsel %vm538_vm2, %v2825_v13, %v2827_v20  ;;  %v2889_v46 = vsel %vm1228_vm7, %v2883_v8, %v2885_v25 }
 0x4de   : > { %v2894_v53 = vmax.f32 %v2879_v42, %v2889_v46 }
 0x4e0   : > { %v2857_v31 = vpop.permute.xlu0 %2856  ;;  %v2812_v34 = vpop.permute.xlu1 %2811 }
 0x4e1   : > { %v2815_v35 = vsel %vm292_vm1, %v2810_v10, %v2812_v34  ;;  %v2821_v36 = vmax.f32 %v2806_v28, %v2812_v34  ;;  %v2860_v50 = vsel %vm952_vm5, %v2855_v22, %v2857_v31  ;;  %v2935_v10 = vsub.s32 %v2932_v5, %v3709_v15 }
 0x4e2   : > { %v2820_v38 = vmax.f32 %v2805_v32, %v2815_v35  ;;  %vm2955_vm5 = vcmp.lt.s32.totalorder %v1523_v2, 286 }
 0x4e3   : > { %v2836_v41 = vmax.f32 %v2821_v36, %v2827_v20 }
 0x4e4   : > { %v2887_v43 = vpop.permute.xlu0 %2886  ;;  %v2835_v44 = vmax.f32 %v2820_v38, %v2830_v1  ;;  %v2842_v45 = vpop.permute.xlu1 %2841 }
 0x4e5   : > { %v2845_v47 = vsel %vm676_vm3, %v2840_v12, %v2842_v45  ;;  %v2851_v48 = vmax.f32 %v2836_v41, %v2842_v45  ;;  %v2890_v0 = vsel %vm1228_vm7, %v2885_v25, %v2887_v43 }
 0x4e6   : > { %v2850_v49 = vmax.f32 %v2835_v44, %v2845_v47 }
 0x4e7   : > { %v2866_v51 = vmax.f32 %v2851_v48, %v2857_v31 }
 0x4e8   : > { %v2900_v54 = vpop.permute.xlu0 %2899  ;;  %v2865_v55 = vmax.f32 %v2850_v49, %v2860_v50  ;;  %v2872_v56 = vpop.permute.xlu1 %2871 }
 0x4e9   : > { %v2904_v59 = vsel %vm1366_vm8, %v2898_v18, %v2900_v54  ;;  %v2875_v60 = vsel %vm1090_vm6, %v2870_v21, %v2872_v56  ;;  %v2881_v61 = vmax.f32 %v2866_v51, %v2872_v56  ;;  %vm2924_vm6 = vcmask 239616  }
 0x4ea   : > { %v2909_v62 = vmax.f32 %v2894_v53, %v2904_v59  ;;  %v2880_v63 = vmax.f32 %v2865_v55, %v2875_v60 }
 0x4eb   : > { %v2896_v3 = vmax.f32 %v2881_v61, %v2887_v43 }
 0x4ec   : > { %v2895_v4 = vmax.f32 %v2880_v63, %v2890_v0  ;;  %v2902_v6 = vpop.permute.xlu1 %2901  ;;  %vm2912_vm1 = vcmp.eq.f32.partialorder %v4091_v52, %v2909_v62 }
 0x4ed   : > { %v2905_v7 = vsel %vm1366_vm8, %v2900_v54, %v2902_v6  ;;  %v2911_v8 = vmax.f32 %v2896_v3, %v2902_v6  ;;  %v2915_v18 = vsel %vm2912_vm1, %v4091_v52, 0.0 }
 0x4ee   : > { %v2910_v9 = vmax.f32 %v2895_v4, %v2905_v7 }
 0x4ef   : > { %vm2914_vm2 = vcmp.eq.f32.partialorder %v4077_v37, %v2911_v8 }
 0x4f0   : > { %vm2913_vm3 = vcmp.eq.f32.partialorder %v4089_v26, %v2910_v9  ;;  %v2917_v40 = vsel %vm2914_vm2, %v4077_v37, 0.0 }
 0x4f1   : > { %v2916_v11 = vsel %vm2913_vm3, %v4089_v26, 0.0  ;;  %v2943_v14 = vrot.slane %v2917_v40, %v2935_v10 }
 0x4f2   : > { %v2929_v12 = vcombine.low %v2915_v18, %v2916_v11 }
 0x4f4   : > { %v2936_v13 = vrot.slane %v2929_v12, %v2935_v10 }
 0x4f6   : > { %v2944_v17 = vcombine.high %v2936_v13, %v2943_v14 }
 0x4f8   : > { %v2951_v19 = vrot.slane %v2944_v17, %v2935_v10 }
 0x4f9   : > { %v2700_v15 = vpop.permute.xlu0 %2699 }
 0x4fa   : > { %3155 = vst.msk [vmem:[%s4071_s20 + $0x1b] ss:$8 sm:$0x7] %vm2955_vm5, %v2951_v19  ;;  %v2705_v21 = vadd.f32 %v2700_v15, %v4066_v29  ;;  %v2706_v52 = vadd.f32 %v2700_v15, %v4073_v33  ;;  %v2707_v22 = vadd.f32 %v2700_v15, %v4056_v16 }
 0x4fc   : > { %2922 = vst [vmem:[%s4071_s20 + $0x18] sm:$0x7] %v2705_v21  ;;  %2923 = vst [vmem:[%s4071_s20 + $0x20] sm:$0x7] %v2706_v52 }
 0x4fd   : > { %2925 = vst.msk [vmem:[%s4071_s20 + $0x28] sm:$0x7] %vm2924_vm6, %v2707_v22 }
 0x4fe PF: > { %s16_s21 = sadd.s32 1, %s3476_s21  }
 0x4ff   : > { %p13_p4 = scmp.ge.s32.totalorder %s16_s21, 4  }
 0x501   :  { %15 = sbr.rel (!%p13_p4) target bundleno = 1 (0x1), region = 91 }

</bundles_post_ra>
